<compile_context>
chip_gen: v6e
topology: v6e:2x2x1
jax: 0.10.0
libtpu: 0.0.40
codegen_flags: <defaults>
</compile_context>

<pallas_src>
import functools

import jax
import jax.numpy as jnp
from jax.experimental import pallas as pl
from jax.experimental.pallas import tpu as pltpu


def _round_up(n, m):
    return (n + m - 1) // m * m


def mlp_kernel(x_ref, w1_ref, b1_ref, w2_ref, b2_ref, o_ref):
    # Layer 1 on the MXU: (TB, D) @ (D, H) -> (TB, H), f32 accumulation.
    x = x_ref[...]                                                    # (TB, D)
    h = jnp.dot(x, w1_ref[...], preferred_element_type=jnp.float32)   # (TB, H)
    h = jnp.maximum(h + b1_ref[...], 0.0)                             # bias + ReLU (VPU)
    # Layer 2 emitted directly as a lane-dense ROW: (1, H) . (TB, H)^T -> (1, TB),
    # so the output store is a wide unmasked vst instead of a (TB, 1) masked column.
    z = jnp.einsum("oh,bh->ob", w2_ref[...], h,
                   preferred_element_type=jnp.float32)                # (1, TB)
    z = z + b2_ref[0]                                                 # scalar bias from SMEM
    o_ref[...] = jax.nn.sigmoid(z).astype(o_ref.dtype)


@functools.partial(jax.jit, static_argnames=("block_b",))
def _mlp_forward_padded(x_pad, w1_t, b1, w2_row, b2, *, block_b):
    B_pad, D = x_pad.shape
    H = w1_t.shape[1]
    grid = (B_pad // block_b,)
    return pl.pallas_call(
        mlp_kernel,
        out_shape=jax.ShapeDtypeStruct((1, B_pad), jnp.float32),      # lane-dense row
        grid_spec=pltpu.PrefetchScalarGridSpec(
            num_scalar_prefetch=0,
            grid=grid,
            in_specs=[
                pl.BlockSpec((block_b, D), lambda i: (i, 0)),         # x tile (streamed)
                pl.BlockSpec((D, H), lambda i: (0, 0)),               # W1^T (resident)
                pl.BlockSpec((1, H), lambda i: (0, 0)),               # b1 (resident)
                pl.BlockSpec((1, H), lambda i: (0, 0)),               # W2 row (resident)
                pl.BlockSpec(memory_space=pltpu.MemorySpace.SMEM),    # b2 scalar
            ],
            out_specs=pl.BlockSpec((1, block_b), lambda i: (0, i)),
        ),
        compiler_params=pltpu.CompilerParams(
            dimension_semantics=("parallel",),   # lets v7x shard the grid over 2 TCs
        ),
    )(x_pad, w1_t, b1, w2_row, b2)


def mlp_forward(x, w1_t, b1, w2_row, b2, *, block_b=1024):
    """sigmoid(relu(x @ w1_t + b1) @ w2_row.T + b2); returns (B, 1) float32."""
    B, D = x.shape
    assert block_b % 128 == 0, "block_b must be a multiple of 128 (lane width)"
    block_b_eff = min(block_b, _round_up(B, 128))
    B_pad = _round_up(B, block_b_eff)
    if B_pad != B:
        x = jnp.pad(x, ((0, B_pad - B), (0, 0)))
    out_row = _mlp_forward_padded(x, w1_t, b1, w2_row, b2, block_b=block_b_eff)
    return out_row.reshape(B_pad, 1)[:B]


def init_params(key, input_dim=128, h_dim=64):
    # Deterministic init mimicking nn.Linear default (uniform +/- 1/sqrt(fan_in)).
    k1, k2, k3, k4 = jax.random.split(key, 4)
    bound1 = 1.0 / jnp.sqrt(input_dim)
    bound2 = 1.0 / jnp.sqrt(h_dim)
    # torch stores W1 as (h_dim, input_dim); keep it pre-transposed: (input_dim, h_dim).
    w1_t = jax.random.uniform(k1, (input_dim, h_dim), jnp.float32, -bound1, bound1)
    b1 = jax.random.uniform(k2, (1, h_dim), jnp.float32, -bound1, bound1)
    # torch stores W2 as (1, h_dim); keep it as that row directly.
    w2_row = jax.random.uniform(k3, (1, h_dim), jnp.float32, -bound2, bound2)
    b2 = jax.random.uniform(k4, (1,), jnp.float32, -bound2, bound2)
    return w1_t, b1, w2_row, b2


def reference_forward(x, w1_t, b1, w2_row, b2):
    h = jnp.maximum(x @ w1_t + b1, 0.0)
    return jax.nn.sigmoid(h @ w2_row.T + b2)


if __name__ == "__main__":
    input_dim, h_dim = 128, 64
    key = jax.random.PRNGKey(0)
    kx, kp, kx2 = jax.random.split(key, 3)
    w1_t, b1, w2_row, b2 = init_params(kp, input_dim, h_dim)

    # Main check: batch big enough for a >=2-step parallel grid (uses both TCs on v7x).
    batch = 2048
    x = jax.random.normal(kx, (batch, input_dim), jnp.float32)
    out = jax.block_until_ready(mlp_forward(x, w1_t, b1, w2_row, b2, block_b=1024))
    ref = reference_forward(x, w1_t, b1, w2_row, b2)
    assert out.shape == (batch, 1)
    assert jnp.allclose(out, ref, atol=1e-5, rtol=1e-5), "mismatch vs reference (big batch)"

    # Ragged / small batch path: padded to the tile internally, sliced back.
    batch2 = 200
    x2 = jax.random.normal(kx2, (batch2, input_dim), jnp.float32)
    out2 = jax.block_until_ready(mlp_forward(x2, w1_t, b1, w2_row, b2))
    ref2 = reference_forward(x2, w1_t, b1, w2_row, b2)
    assert out2.shape == (batch2, 1)
    assert jnp.allclose(out2, ref2, atol=1e-5, rtol=1e-5), "mismatch vs reference (ragged)"

    # TODO(synk): optional bf16 x/w1 path (halves HBM traffic) omitted to keep
    # the 1e-5 f32 tolerance against the reference.
    print("KERNEL_OK")
</pallas_src>

<mosaic_0001>
module attributes {stable_mosaic.version = 11 : i64} {
  func.func @mlp_kernel(%arg0: i32, %arg1: memref<1024x128xf32, #tpu.memory_space<vmem>>, %arg2: memref<128x64xf32, #tpu.memory_space<vmem>>, %arg3: memref<1x64xf32, #tpu.memory_space<vmem>>, %arg4: memref<1x64xf32, #tpu.memory_space<vmem>>, %arg5: memref<1xf32, #tpu.memory_space<smem>>, %arg6: memref<1x1024xf32, #tpu.memory_space<vmem>>) attributes {dimension_semantics = [#tpu.dimension_semantics<parallel>], iteration_bounds = array<i64: 2>, scalar_prefetch = 0 : i64, scratch_operands = 0 : i64, tpu.core_type = #tpu.core_type<tc>, window_params = [{transform_indices = @transform_0, window_bounds = array<i64: 1024, 128>}, {pipeline_mode = #tpu.pipeline_mode<synchronous>, transform_indices = @transform_1, window_bounds = array<i64: 128, 64>}, {pipeline_mode = #tpu.pipeline_mode<synchronous>, transform_indices = @transform_2, window_bounds = array<i64: 1, 64>}, {pipeline_mode = #tpu.pipeline_mode<synchronous>, transform_indices = @transform_3, window_bounds = array<i64: 1, 64>}, {transform_indices = @transform_4, window_bounds = array<i64: 1>}, {transform_indices = @transform_5, window_bounds = array<i64: 1, 1024>}]} {
    %c0 = arith.constant 0 : index
    %c0_0 = arith.constant 0 : index
    %0 = vector.load %arg1[%c0, %c0_0] : memref<1024x128xf32, #tpu.memory_space<vmem>>, vector<1024x128xf32>
    %c0_1 = arith.constant 0 : index
    %c0_2 = arith.constant 0 : index
    %1 = vector.load %arg2[%c0_1, %c0_2] : memref<128x64xf32, #tpu.memory_space<vmem>>, vector<128x64xf32>
    %cst = arith.constant dense<0.000000e+00> : vector<1024x64xf32>
    %2 = tpu.matmul %0, %1, %cst {dimension_numbers = #tpu.dot_dimension_numbers<[1], [0], [0], [1], [0, 0, 1, 1], [], []>} : vector<1024x128xf32>, vector<128x64xf32>, vector<1024x64xf32> -> vector<1024x64xf32>
    %c0_3 = arith.constant 0 : index
    %c0_4 = arith.constant 0 : index
    %3 = vector.load %arg3[%c0_3, %c0_4] : memref<1x64xf32, #tpu.memory_space<vmem>>, vector<1x64xf32>
    %4 = vector.broadcast %3 : vector<1x64xf32> to vector<1024x64xf32>
    %5 = arith.addf %2, %4 : vector<1024x64xf32>
    %cst_5 = arith.constant 0.000000e+00 : f32
    %6 = vector.broadcast %cst_5 : f32 to vector<1024x64xf32>
    %7 = arith.maximumf %5, %6 : vector<1024x64xf32>
    %c0_6 = arith.constant 0 : index
    %c0_7 = arith.constant 0 : index
    %8 = vector.load %arg4[%c0_6, %c0_7] : memref<1x64xf32, #tpu.memory_space<vmem>>, vector<1x64xf32>
    "tpu.trace_start"() <{level = 10 : i32, message = "oh,bh->ob"}> : () -> ()
    %cst_8 = arith.constant dense<0.000000e+00> : vector<1x1024xf32>
    %9 = tpu.matmul %8, %7, %cst_8 {dimension_numbers = #tpu.dot_dimension_numbers<[1], [1], [0], [0], [0, 0, 1, 0], [], []>} : vector<1x64xf32>, vector<1024x64xf32>, vector<1x1024xf32> -> vector<1x1024xf32>
    "tpu.trace_stop"() : () -> ()
    %c0_9 = arith.constant 0 : index
    %10 = memref.load %arg5[%c0_9] : memref<1xf32, #tpu.memory_space<smem>>
    %11 = vector.broadcast %10 : f32 to vector<1x1024xf32>
    %12 = arith.addf %9, %11 : vector<1x1024xf32>
    %13 = arith.negf %12 : vector<1x1024xf32>
    %14 = math.exp %13 : vector<1x1024xf32>
    %cst_10 = arith.constant 1.000000e+00 : f32
    %15 = vector.broadcast %cst_10 : f32 to vector<1x1024xf32>
    %16 = arith.addf %15, %14 : vector<1x1024xf32>
    %17 = arith.divf %15, %16 : vector<1x1024xf32>
    %c0_11 = arith.constant 0 : index
    %c0_12 = arith.constant 0 : index
    %18 = vector.load %arg6[%c0_11, %c0_12] : memref<1x1024xf32, #tpu.memory_space<vmem>>, vector<1x1024xf32>
    tpu.vector_store %arg6[%c0_11, %c0_12], %17 {strides = array<i32>} : memref<1x1024xf32, #tpu.memory_space<vmem>>, vector<1x1024xf32>,
    return
  }
  func.func @transform_0(%arg0: i32) -> (i32, i32) {
    %c0_i32 = arith.constant 0 : i32
    %c0_i32_0 = arith.constant 0 : i32
    return %arg0, %c0_i32 : i32, i32
  }
  func.func @transform_1(%arg0: i32) -> (i32, i32) {
    %c0_i32 = arith.constant 0 : i32
    %c0_i32_0 = arith.constant 0 : i32
    %c0_i32_1 = arith.constant 0 : i32
    return %c0_i32, %c0_i32_0 : i32, i32
  }
  func.func @transform_2(%arg0: i32) -> (i32, i32) {
    %c0_i32 = arith.constant 0 : i32
    %c0_i32_0 = arith.constant 0 : i32
    %c0_i32_1 = arith.constant 0 : i32
    return %c0_i32, %c0_i32_0 : i32, i32
  }
  func.func @transform_3(%arg0: i32) -> (i32, i32) {
    %c0_i32 = arith.constant 0 : i32
    %c0_i32_0 = arith.constant 0 : i32
    %c0_i32_1 = arith.constant 0 : i32
    return %c0_i32, %c0_i32_0 : i32, i32
  }
  func.func @transform_4(%arg0: i32) -> i32 {
    %c0_i32 = arith.constant 0 : i32
    %c0_i32_0 = arith.constant 0 : i32
    return %c0_i32 : i32
  }
  func.func @transform_5(%arg0: i32) -> (i32, i32) {
    %c0_i32 = arith.constant 0 : i32
    %c0_i32_0 = arith.constant 0 : i32
    return %c0_i32, %arg0 : i32, i32
  }
}

</mosaic_0001>

<bundles_post_ra>
// kernel: _mlp_forward_padded.1
= control target key start
LH: loop header
LB: loop body
LE: loop exit
PB: predicated region body
PF: predicated region fallthrough
CT: control target
= control target key end

     0   :  { %s3863_s0 = inlined_call_operand.hbm [shape: f32[2048,128], index: 0, kind: input, shape index: {}]   ;;  %s3864_s1 = inlined_call_operand.vmem [shape: f32[128,64], index: 1, kind: input, shape index: {}]   ;;  %s3865_s2 = inlined_call_operand.vmem [shape: f32[1,64], index: 2, kind: input, shape index: {}]   ;;  %s3866_s3 = inlined_call_operand.vmem [shape: f32[1,64], index: 3, kind: input, shape index: {}]   ;;  %s3867_s4 = inlined_call_operand.<no memory space> [shape: f32[1], index: 4, kind: input, shape index: {}]   ;;  %s3868_s5 = inlined_call_operand.hbm [shape: f32[1,2048], index: 5, kind: output, shape index: {}]  }
   0x1   :  { %10 = sst [smem:[#allocation2]] %s3867_s4 }
   0x2   :  { %11 = vsyncpa [#allocation4], 0 }
   0x3   :  { %13 = vsyncpa [#allocation4 + $0x1], 0 }
   0x4   :  { %14 = vsyncpa [#allocation5], 0 }
   0x5   :  { %16 = vsyncpa [#allocation5 + $0x1], 0  ;;  %s2972_s20 = smov 0   ;;  %s2974_s21 = smov 0  }
   0x6   :  { %s2976_s22 = smov 0   ;;  %s2978_s23 = smov 0  }
   0x7 LB: > { %s2993_s4 = sadd.s32 4294967295, %s2932_s23   ;;  %s2097_s24 = sadd.s32 4294967294, %s2932_s23   ;;  %s2932_s23 = sphi %s2978_s23, %s3883_s23   ;;  %s2928_s22 = sphi %s2976_s22, %s3882_s22   ;;  %s2924_s21 = sphi %s2974_s21, %s3881_s21   ;;  %s2920_s20 = sphi %s2972_s20, %s3880_s20  }
   0x8   : > { %s2997_s25 = sadd.s32 1, %s2932_s23   ;;  %s29_s26 = sadd.s32 1, %s2928_s22 }
   0x9   : > { %s26_s27 = ssub.s32 %s2932_s23, %s2997_s25  ;;  %p36_p0 = scmp.ne.s32.totalorder %s2928_s22, %s2924_s21 }
   0xa   : > { %p27_p1 = scmp.eq.s32.totalorder %s26_s27, 0  ;;  %p37_p2 = scmp.eq.s32.totalorder %s2932_s23, 0 }
   0xb   : > { %p42_p3 = scmp.ne.s32.totalorder %s2924_s21, %s2920_s20  ;;  %p43_p4 = scmp.eq.s32.totalorder %s2993_s4, 0 }
   0xc   : > { %s3009_s28 = scalar_select %p27_p1, %s2928_s22, %s29_s26  }
   0xd   : > { %p3011_p5 = por %p37_p2, %p36_p0  ;;  %p3015_p6 = por %p43_p4, %p42_p3 }
   0xe   : > { %p150_p7 = scmp.eq.s32.totalorder %s2993_s4, 1  ;;  %p156_p8 = scmp.eq.s32.totalorder %s2097_s24, 1 }
   0xf   : > { %s3872_s30 = scalar_select %p3015_p6, 1, 0 }
  0x10   : > { %p2770_p10 = scmp.lt.s32.totalorder %s2932_s23, 2  ;;  %p3022_p11 = por %p150_p7, %p36_p0 }
  0x11   : > { %p3026_p12 = por %p156_p8, %p42_p3  ;;  %s188_s8 = sand.u32 1, %s2928_s22  }
  0x12   : > { %s3873_s6 = scalar_select %p3022_p11, 1, 0 }
  0x13   : > { %s3874_s7 = scalar_select %p3026_p12, 1, 0 }
  0x14   : > { %s2252_s9 = sshll.u32 %s2932_s23, 14  ;;  %s2100_s10 = sshll.u32 %s188_s8, 10 }
  0x15   : > { %s3035_s13 = scalar_lea.hbm %s3863_s0, %s2252_s9  ;;  %s192_s14 = scalar_lea.vmem [#allocation3], %s2100_s10 }
  0x16   : > { %s199_s15 = sshll.u32 %s192_s14, 4  ;;  %p3039_p13 = pnand %p2770_p10, %p3011_p5  ;;  %s3043_s15 = int_to_ptr.vmem [resolvable:$true] %s199_s15 }
  0x17   : > { %s3045_s17 = scalar_lea.sflag [#allocation4], %s188_s8  ;;  %s2840_s18 = scalar_lea.hbm %s3035_s13, 16384 }
  0x18   : > { %p2841_p0 = scmp.ne.s32.totalorder %s3035_s13, %s2840_s18  ;;  %p2842_p1 = pneg %p3039_p13 }
  0x19   : > { %s2845_s26 = scalar_lea.hbm %s3863_s0, 32768  ;;  %p2846_p4 = scmp.lt.s32.totalorder %s3035_s13, %s3863_s0 }
  0x1a   : > { %p2843_p2 = pnand %p2842_p1, %p2841_p0  ;;  %p2847_p5 = scmp.lt.s32.totalorder %s2845_s26, %s2840_s18 }
  0x1c   : > { %p2844_p3 = pneg %p2843_p2  ;;  %p2848_p7 = por %p2847_p5, %p2846_p4 }
  0x1e   : > { %p2849_p8 = pnand %p2848_p7, %p2844_p3 }
  0x20   : > { %2852 = shalt.err (!%p2849_p8)
}
  0x21   : > { %s2853_s8 = scalar_lea.vmem %s3043_s15, 16384  ;;  %s2934_s9 = smov [#allocation3]  }
  0x22   : > { %p2854_p10 = scmp.ne.s32.totalorder %s3043_s15, %s2853_s8  ;;  %s2858_s10 = sshll.u32 %s2934_s9, 4  ;;  %s2859_s10 = int_to_ptr.vmem [resolvable:$false] %s2858_s10 }
  0x23   : > { %s2860_s11 = scalar_lea.vmem %s2859_s10, 32768  ;;  %p2861_p2 = scmp.lt.s32.totalorder %s3043_s15, %s2859_s10 }
  0x24   : > { %p2856_p9 = pnand %p2854_p10, %p2842_p1  ;;  %p2862_p12 = scmp.lt.s32.totalorder %s2860_s11, %s2853_s8 }
  0x26   : > { %p2857_p0 = pneg %p2856_p9  ;;  %p2863_p11 = por %p2862_p12, %p2861_p2 }
  0x28   : > { %p2864_p6 = pnand %p2863_p11, %p2857_p0 }
  0x2a   : > { %2867 = shalt.err (!%p2864_p6)
}
  0x2b   : > { %s2935_s12 = smov 128   ;;  %s2936_s14 = smov 8  }
  0x2c   : > { %2765 = dma.hbm_to_vmem [thread:$0]  (!%p3039_p13), %s3035_s13, 16384, %s3043_s15, %s3045_s17, %s2935_s12, %s2935_s12, %s2936_s14  }
  0x2d   : > { %p2103_p9 = scmp.ge.s32.totalorder %s2932_s23, 1  ;;  %p207_p1 = scmp.lt.s32.totalorder %s2932_s23, 3 }
  0x2f   : > { %p208_p3 = pnand %p2103_p9, %p207_p1 }
  0x30   : > { %s3069_s18 = sand.u32 (!%p208_p3), 1, %s2924_s21   ;;  %p3876_p6 = scmp.ne.s32.totalorder (!%p208_p3), %s3872_s30, 0 }
  0x31   : > { %211 = sbr.rel (%p208_p3) target bundleno = 853 (0x355), region = 40  ;;  %s2104_s19 = sshll.u32 (!%p208_p3), %s3069_s18, 10 }
  0x32   : > { %s214_s24 = scalar_lea.sflag (!%p208_p3), [#allocation4], %s3069_s18  ;;  %s3073_s26 = scalar_lea.vmem (!%p208_p3), [#allocation3], %s2104_s19 }
  0x36   : > { %2911 = dma.done.wait (%p3876_p6), %s214_s24, 16384  }
  0x37   : > { %2913 = vsyncadd (%p3876_p6), %s214_s24, 4294950912  ;;  %v389_v0 = vld [vmem:[%s3864_s1 + $0x78] sm:$0xff]  ;;  %v388_v1 = vld [vmem:[%s3864_s1 + $0x70] sm:$0xff]  ;;  %vm1233_vm0 = vcmask 523264   ;;  %s1231_s30 = sld [smem:[#allocation2]]  ;;  %s2105_s9 = sshll.u32 %s3069_s18, 3 }
  0x38   : > { %2534 = vmatprep.subr.mxu0 %v389_v0  ;;  %v387_v2 = vld [vmem:[%s3864_s1 + $0x68] sm:$0xff]  ;;  %v386_v3 = vld [vmem:[%s3864_s1 + $0x60] sm:$0xff]  ;;  %v385_v5 = vld [vmem:[%s3864_s1 + $0x58] sm:$0xff]  ;;  %s2253_s10 = sshll.u32 %s2993_s4, 7  ;;  %s243_s11 = scalar_lea.vmem [#allocation6], %s2105_s9 }
  0x39   : > { %2535 = vmatpush3.msra.mxu0 %v389_v0  ;;  %v246_v4 = vld [vmem:[%s3073_s26] sm:$0xff]  ;;  %v384_v6 = vld [vmem:[%s3864_s1 + $0x50] sm:$0xff]  ;;  %v383_v7 = vld [vmem:[%s3864_s1 + $0x48] sm:$0xff]  ;;  %s2027_s12 = sshll.u32 %s243_s11, 4  ;;  %s2025_s24 = scalar_lea.hbm %s3868_s5, %s2253_s10  ;;  %s2028_s12 = int_to_ptr.vmem [resolvable:$true] %s2027_s12 }
  0x3a   : > { %2536 = vmatprep.subr.mxu0 %v388_v1  ;;  %2566 = vmatprep.mubr.f32.mxu0 %v246_v4  ;;  %v382_v8 = vld [vmem:[%s3864_s1 + $0x40] sm:$0xff]  ;;  %v381_v9 = vld [vmem:[%s3864_s1 + $0x38] sm:$0xff]  ;;  %v380_v10 = vld [vmem:[%s3864_s1 + $0x30] sm:$0xff]  ;;  %s2013_s13 = scalar_lea.sflag [#allocation5], %s3069_s18  ;;  %s2868_s15 = scalar_lea.vmem %s2028_s12, 128 }
  0x3b   : > { %2537 = vmatpush3.msra.mxu0 %v388_v1  ;;  %v379_v11 = vld [vmem:[%s3864_s1 + $0x28] sm:$0xff]  ;;  %v378_v12 = vld [vmem:[%s3864_s1 + $0x20] sm:$0xff]  ;;  %v377_v13 = vld [vmem:[%s3864_s1 + $0x18] sm:$0xff]  ;;  %p2869_p11 = scmp.ne.s32.totalorder %s2028_s12, %s2868_s15  ;;  %p3877_p12 = scmp.ne.s32.totalorder %s3873_s6, 0 }
  0x3c   : > { %2538 = vmatprep.subr.mxu0 %v387_v2  ;;  %v376_v14 = vld [vmem:[%s3864_s1 + $0x10] sm:$0xff]  ;;  %v375_v15 = vld [vmem:[%s3864_s1 + $0x8] sm:$0xff]  ;;  %v374_v16 = vld [vmem:[%s3864_s1] sm:$0xff]  ;;  %s2938_s16 = smov [#allocation6]  }
  0x3d   : > { %2539 = vmatpush3.msra.mxu0 %v387_v2  ;;  %v247_v17 = vld [vmem:[%s3073_s26 + $0x8] sm:$0xff]  ;;  %v248_v18 = vld [vmem:[%s3073_s26 + $0x10] sm:$0xff]  ;;  %v249_v19 = vld [vmem:[%s3073_s26 + $0x18] sm:$0xff]  ;;  %p2870_p13 = pnand %p2869_p11, %p3877_p12  ;;  %s2872_s17 = sshll.u32 %s2938_s16, 4  ;;  %s2873_s17 = int_to_ptr.vmem [resolvable:$false] %s2872_s17 }
  0x3e   : > { %2540 = vmatprep.subr.mxu0 %v386_v3  ;;  %v250_v20 = vld [vmem:[%s3073_s26 + $0x20] sm:$0xff]  ;;  %v251_v21 = vld [vmem:[%s3073_s26 + $0x28] sm:$0xff]  ;;  %v252_v22 = vld [vmem:[%s3073_s26 + $0x30] sm:$0xff]  ;;  %s2874_s4 = scalar_lea.vmem %s2873_s17, 256  ;;  %p2875_p5 = scmp.lt.s32.totalorder %s2028_s12, %s2873_s17 }
  0x3f   : > { %2541 = vmatpush3.msra.mxu0 %v386_v3  ;;  %v253_v23 = vld [vmem:[%s3073_s26 + $0x38] sm:$0xff]  ;;  %v254_v24 = vld [vmem:[%s3073_s26 + $0x40] sm:$0xff]  ;;  %v255_v25 = vld [vmem:[%s3073_s26 + $0x48] sm:$0xff]  ;;  %p2871_p4 = pneg %p2870_p13  ;;  %p2876_p7 = scmp.lt.s32.totalorder %s2874_s4, %s2868_s15 }
  0x40   : > { %2542 = vmatprep.subr.mxu0 %v385_v5  ;;  %v256_v26 = vld [vmem:[%s3073_s26 + $0x50] sm:$0xff]  ;;  %v257_v27 = vld [vmem:[%s3073_s26 + $0x58] sm:$0xff]  ;;  %v258_v28 = vld [vmem:[%s3073_s26 + $0x60] sm:$0xff] }
  0x41   : > { %2543 = vmatpush3.msra.mxu0 %v385_v5  ;;  %v259_v29 = vld [vmem:[%s3073_s26 + $0x68] sm:$0xff]  ;;  %v260_v30 = vld [vmem:[%s3073_s26 + $0x70] sm:$0xff]  ;;  %v261_v31 = vld [vmem:[%s3073_s26 + $0x78] sm:$0xff]  ;;  %p2877_p8 = por %p2876_p7, %p2875_p5 }
  0x42   : > { %2544 = vmatprep.subr.mxu0 %v384_v6  ;;  %v262_v32 = vld [vmem:[%s3073_s26 + $0x80] sm:$0xff]  ;;  %v263_v33 = vld [vmem:[%s3073_s26 + $0x88] sm:$0xff]  ;;  %v264_v34 = vld [vmem:[%s3073_s26 + $0x90] sm:$0xff] }
  0x43   : > { %2545 = vmatpush3.msra.mxu0 %v384_v6  ;;  %v265_v35 = vld [vmem:[%s3073_s26 + $0x98] sm:$0xff]  ;;  %v266_v36 = vld [vmem:[%s3073_s26 + $0xa0] sm:$0xff]  ;;  %v267_v37 = vld [vmem:[%s3073_s26 + $0xa8] sm:$0xff]  ;;  %p2878_p10 = pnand %p2877_p8, %p2871_p4 }
  0x44   : > { %2546 = vmatprep.subr.mxu0 %v383_v7  ;;  %v268_v38 = vld [vmem:[%s3073_s26 + $0xb0] sm:$0xff]  ;;  %v269_v39 = vld [vmem:[%s3073_s26 + $0xb8] sm:$0xff]  ;;  %v270_v40 = vld [vmem:[%s3073_s26 + $0xc0] sm:$0xff] }
  0x45   : > { %2547 = vmatpush3.msra.mxu0 %v383_v7  ;;  %v271_v41 = vld [vmem:[%s3073_s26 + $0xc8] sm:$0xff]  ;;  %v272_v42 = vld [vmem:[%s3073_s26 + $0xd0] sm:$0xff]  ;;  %v273_v43 = vld [vmem:[%s3073_s26 + $0xd8] sm:$0xff] }
  0x46   : > { %2548 = vmatprep.subr.mxu0 %v382_v8  ;;  %v274_v44 = vld [vmem:[%s3073_s26 + $0xe0] sm:$0xff]  ;;  %v275_v45 = vld [vmem:[%s3073_s26 + $0xe8] sm:$0xff]  ;;  %v276_v46 = vld [vmem:[%s3073_s26 + $0xf0] sm:$0xff] }
  0x47   : > { %2549 = vmatpush3.msra.mxu0 %v382_v8  ;;  %v277_v47 = vld [vmem:[%s3073_s26 + $0xf8] sm:$0xff]  ;;  %v278_v48 = vld [vmem:[%s3073_s26 + $0x100] sm:$0xff]  ;;  %v279_v49 = vld [vmem:[%s3073_s26 + $0x108] sm:$0xff] }
  0x48   : > { %2550 = vmatprep.subr.mxu0 %v381_v9  ;;  %v280_v50 = vld [vmem:[%s3073_s26 + $0x110] sm:$0xff]  ;;  %v281_v51 = vld [vmem:[%s3073_s26 + $0x118] sm:$0xff]  ;;  %v282_v52 = vld [vmem:[%s3073_s26 + $0x120] sm:$0xff] }
  0x49   : > { %2551 = vmatpush3.msra.mxu0 %v381_v9  ;;  %v283_v53 = vld [vmem:[%s3073_s26 + $0x128] sm:$0xff]  ;;  %v284_v54 = vld [vmem:[%s3073_s26 + $0x130] sm:$0xff]  ;;  %v285_v55 = vld [vmem:[%s3073_s26 + $0x138] sm:$0xff] }
  0x4a   : > { %2552 = vmatprep.subr.mxu0 %v380_v10  ;;  %v286_v56 = vld [vmem:[%s3073_s26 + $0x140] sm:$0xff]  ;;  %v287_v57 = vld [vmem:[%s3073_s26 + $0x148] sm:$0xff]  ;;  %v288_v58 = vld [vmem:[%s3073_s26 + $0x150] sm:$0xff] }
  0x4b   : > { %2553 = vmatpush3.msra.mxu0 %v380_v10  ;;  %v289_v59 = vld [vmem:[%s3073_s26 + $0x158] sm:$0xff]  ;;  %v290_v60 = vld [vmem:[%s3073_s26 + $0x160] sm:$0xff]  ;;  %v291_v61 = vld [vmem:[%s3073_s26 + $0x168] sm:$0xff] }
  0x4c   : > { %2554 = vmatprep.subr.mxu0 %v379_v11  ;;  %v292_v62 = vld [vmem:[%s3073_s26 + $0x170] sm:$0xff]  ;;  %v293_v63 = vld [vmem:[%s3073_s26 + $0x178] sm:$0xff]  ;;  %v294_v0 = vld [vmem:[%s3073_s26 + $0x180] sm:$0xff] }
  0x4d   : > { %2555 = vmatpush3.msra.mxu0 %v379_v11  ;;  %v295_v1 = vld [vmem:[%s3073_s26 + $0x188] sm:$0xff]  ;;  %v296_v2 = vld [vmem:[%s3073_s26 + $0x190] sm:$0xff]  ;;  %v297_v3 = vld [vmem:[%s3073_s26 + $0x198] sm:$0xff] }
  0x4e   : > { %2556 = vmatprep.subr.mxu0 %v378_v12  ;;  %v298_v4 = vld [vmem:[%s3073_s26 + $0x1a0] sm:$0xff]  ;;  %v299_v5 = vld [vmem:[%s3073_s26 + $0x1a8] sm:$0xff]  ;;  %v300_v6 = vld [vmem:[%s3073_s26 + $0x1b0] sm:$0xff] }
  0x4f   : > { %2557 = vmatpush3.msra.mxu0 %v378_v12  ;;  %v301_v7 = vld [vmem:[%s3073_s26 + $0x1b8] sm:$0xff]  ;;  %v302_v8 = vld [vmem:[%s3073_s26 + $0x1c0] sm:$0xff]  ;;  %v303_v9 = vld [vmem:[%s3073_s26 + $0x1c8] sm:$0xff] }
  0x50   : > { %2558 = vmatprep.subr.mxu0 %v377_v13  ;;  %v304_v10 = vld [vmem:[%s3073_s26 + $0x1d0] sm:$0xff]  ;;  %v305_v11 = vld [vmem:[%s3073_s26 + $0x1d8] sm:$0xff]  ;;  %v306_v12 = vld [vmem:[%s3073_s26 + $0x1e0] sm:$0xff] }
  0x51   : > { %2559 = vmatpush3.msra.mxu0 %v377_v13  ;;  %v307_v13 = vld [vmem:[%s3073_s26 + $0x1e8] sm:$0xff] }
  0x52   : > { %2560 = vmatprep.subr.mxu0 %v376_v14 }
  0x53   : > { %2561 = vmatpush3.msra.mxu0 %v376_v14  ;;  %v308_v14 = vld [vmem:[%s3073_s26 + $0x1f0] sm:$0xff] }
  0x54   : > { %2562 = vmatprep.subr.mxu0 %v375_v15 }
  0x55   : > { %2563 = vmatpush3.msra.mxu0 %v375_v15  ;;  %v309_v15 = vld [vmem:[%s3073_s26 + $0x1f8] sm:$0xff] }
  0x56   : > { %2564 = vmatprep.subr.mxu0 %v374_v16 }
  0x57   : > { %2565 = vmatpush3.msra.mxu0 %v374_v16  ;;  %v310_v16 = vld [vmem:[%s3073_s26 + $0x200] sm:$0xff] }
  0x58   : > { %2567 = vmatmul.mubr.f32.vlgmr.msra.gmra.mxu0 %v247_v17  ;;  %v311_v17 = vld [vmem:[%s3073_s26 + $0x208] sm:$0xff] }
  0x59   : > { %2569 = vmatprep.mubr.f32.mxu0 %v248_v18  ;;  %v312_v18 = vld [vmem:[%s3073_s26 + $0x210] sm:$0xff] }
  0x5c   : > { %2570 = vmatmul.mubr.f32.gmra.mxu0 %v249_v19  ;;  %v313_v19 = vld [vmem:[%s3073_s26 + $0x218] sm:$0xff] }
  0x5d   : > { %2572 = vmatprep.mubr.f32.mxu0 %v250_v20  ;;  %v314_v20 = vld [vmem:[%s3073_s26 + $0x220] sm:$0xff] }
  0x60   : > { %2573 = vmatmul.mubr.f32.gmra.mxu0 %v251_v21  ;;  %v315_v21 = vld [vmem:[%s3073_s26 + $0x228] sm:$0xff] }
  0x61   : > { %2575 = vmatprep.mubr.f32.mxu0 %v252_v22  ;;  %v316_v22 = vld [vmem:[%s3073_s26 + $0x230] sm:$0xff] }
  0x64   : > { %2576 = vmatmul.mubr.f32.gmra.mxu0 %v253_v23  ;;  %v317_v23 = vld [vmem:[%s3073_s26 + $0x238] sm:$0xff] }
  0x65   : > { %2578 = vmatprep.mubr.f32.mxu0 %v254_v24  ;;  %v318_v24 = vld [vmem:[%s3073_s26 + $0x240] sm:$0xff] }
  0x68   : > { %2579 = vmatmul.mubr.f32.gmra.mxu0 %v255_v25  ;;  %v319_v25 = vld [vmem:[%s3073_s26 + $0x248] sm:$0xff] }
  0x69   : > { %2581 = vmatprep.mubr.f32.mxu0 %v256_v26  ;;  %v320_v26 = vld [vmem:[%s3073_s26 + $0x250] sm:$0xff] }
  0x6c   : > { %2582 = vmatmul.mubr.f32.gmra.mxu0 %v257_v27  ;;  %v321_v27 = vld [vmem:[%s3073_s26 + $0x258] sm:$0xff] }
  0x6d   : > { %2584 = vmatprep.mubr.f32.mxu0 %v258_v28  ;;  %v322_v28 = vld [vmem:[%s3073_s26 + $0x260] sm:$0xff] }
  0x70   : > { %2585 = vmatmul.mubr.f32.gmra.mxu0 %v259_v29  ;;  %v323_v29 = vld [vmem:[%s3073_s26 + $0x268] sm:$0xff] }
  0x71   : > { %2587 = vmatprep.mubr.f32.mxu0 %v260_v30  ;;  %v324_v30 = vld [vmem:[%s3073_s26 + $0x270] sm:$0xff] }
  0x74   : > { %2588 = vmatmul.mubr.f32.gmra.mxu0 %v261_v31  ;;  %v325_v31 = vld [vmem:[%s3073_s26 + $0x278] sm:$0xff] }
  0x75   : > { %2590 = vmatprep.mubr.f32.mxu0 %v262_v32  ;;  %v326_v32 = vld [vmem:[%s3073_s26 + $0x280] sm:$0xff] }
  0x78   : > { %2591 = vmatmul.mubr.f32.gmra.mxu0 %v263_v33  ;;  %v327_v33 = vld [vmem:[%s3073_s26 + $0x288] sm:$0xff] }
  0x79   : > { %2593 = vmatprep.mubr.f32.mxu0 %v264_v34  ;;  %v328_v34 = vld [vmem:[%s3073_s26 + $0x290] sm:$0xff] }
  0x7c   : > { %2594 = vmatmul.mubr.f32.gmra.mxu0 %v265_v35  ;;  %v329_v35 = vld [vmem:[%s3073_s26 + $0x298] sm:$0xff] }
  0x7d   : > { %2596 = vmatprep.mubr.f32.mxu0 %v266_v36  ;;  %v330_v36 = vld [vmem:[%s3073_s26 + $0x2a0] sm:$0xff] }
  0x80   : > { %2597 = vmatmul.mubr.f32.gmra.mxu0 %v267_v37  ;;  %v331_v37 = vld [vmem:[%s3073_s26 + $0x2a8] sm:$0xff] }
  0x81   : > { %2599 = vmatprep.mubr.f32.mxu0 %v268_v38  ;;  %v332_v38 = vld [vmem:[%s3073_s26 + $0x2b0] sm:$0xff] }
  0x84   : > { %2600 = vmatmul.mubr.f32.gmra.mxu0 %v269_v39  ;;  %v333_v39 = vld [vmem:[%s3073_s26 + $0x2b8] sm:$0xff] }
  0x85   : > { %2602 = vmatprep.mubr.f32.mxu0 %v270_v40  ;;  %v334_v40 = vld [vmem:[%s3073_s26 + $0x2c0] sm:$0xff] }
  0x88   : > { %2603 = vmatmul.mubr.f32.gmra.mxu0 %v271_v41  ;;  %v335_v41 = vld [vmem:[%s3073_s26 + $0x2c8] sm:$0xff] }
  0x89   : > { %2605 = vmatprep.mubr.f32.mxu0 %v272_v42  ;;  %v336_v42 = vld [vmem:[%s3073_s26 + $0x2d0] sm:$0xff] }
  0x8c   : > { %2606 = vmatmul.mubr.f32.gmra.mxu0 %v273_v43  ;;  %v337_v43 = vld [vmem:[%s3073_s26 + $0x2d8] sm:$0xff] }
  0x8d   : > { %2608 = vmatprep.mubr.f32.mxu0 %v274_v44  ;;  %v338_v44 = vld [vmem:[%s3073_s26 + $0x2e0] sm:$0xff] }
  0x90   : > { %2609 = vmatmul.mubr.f32.gmra.mxu0 %v275_v45  ;;  %v339_v45 = vld [vmem:[%s3073_s26 + $0x2e8] sm:$0xff] }
  0x91   : > { %2611 = vmatprep.mubr.f32.mxu0 %v276_v46  ;;  %v340_v46 = vld [vmem:[%s3073_s26 + $0x2f0] sm:$0xff] }
  0x94   : > { %2612 = vmatmul.mubr.f32.gmra.mxu0 %v277_v47  ;;  %v341_v47 = vld [vmem:[%s3073_s26 + $0x2f8] sm:$0xff] }
  0x95   : > { %2614 = vmatprep.mubr.f32.mxu0 %v278_v48  ;;  %v342_v48 = vld [vmem:[%s3073_s26 + $0x300] sm:$0xff] }
  0x98   : > { %2615 = vmatmul.mubr.f32.gmra.mxu0 %v279_v49  ;;  %v343_v49 = vld [vmem:[%s3073_s26 + $0x308] sm:$0xff] }
  0x99   : > { %2617 = vmatprep.mubr.f32.mxu0 %v280_v50  ;;  %v344_v50 = vld [vmem:[%s3073_s26 + $0x310] sm:$0xff] }
  0x9c   : > { %2618 = vmatmul.mubr.f32.gmra.mxu0 %v281_v51  ;;  %v3229_v51 = vld [vmem:[%s3866_s3] sm:$0x1] }
  0x9d   : > { %2620 = vmatprep.mubr.f32.mxu0 %v282_v52  ;;  %2430 = vmatprep.mubr.msk.f32.mxu1 %vm1233_vm0, %v3229_v51 }
  0xa0   : > { %2621 = vmatmul.mubr.f32.gmra.mxu0 %v283_v53  ;;  %v345_v53 = vld [vmem:[%s3073_s26 + $0x318] sm:$0xff] }
  0xa1   : > { %2623 = vmatprep.mubr.f32.mxu0 %v284_v54 }
  0xa4   : > { %2624 = vmatmul.mubr.f32.gmra.mxu0 %v285_v55  ;;  %v346_v55 = vld [vmem:[%s3073_s26 + $0x320] sm:$0xff] }
  0xa5   : > { %2626 = vmatprep.mubr.f32.mxu0 %v286_v56 }
  0xa8   : > { %2627 = vmatmul.mubr.f32.gmra.mxu0 %v287_v57  ;;  %v347_v57 = vld [vmem:[%s3073_s26 + $0x328] sm:$0xff] }
  0xa9   : > { %2629 = vmatprep.mubr.f32.mxu0 %v288_v58 }
  0xac   : > { %2630 = vmatmul.mubr.f32.gmra.mxu0 %v289_v59  ;;  %v348_v59 = vld [vmem:[%s3073_s26 + $0x330] sm:$0xff] }
  0xad   : > { %2632 = vmatprep.mubr.f32.mxu0 %v290_v60 }
  0xb0   : > { %2633 = vmatmul.mubr.f32.gmra.mxu0 %v291_v61  ;;  %v349_v61 = vld [vmem:[%s3073_s26 + $0x338] sm:$0xff] }
  0xb1   : > { %2635 = vmatprep.mubr.f32.mxu0 %v292_v62 }
  0xb4   : > { %2636 = vmatmul.mubr.f32.gmra.mxu0 %v293_v63  ;;  %v350_v63 = vld [vmem:[%s3073_s26 + $0x340] sm:$0xff] }
  0xb5   : > { %2638 = vmatprep.mubr.f32.mxu0 %v294_v0 }
  0xb8   : > { %2639 = vmatmul.mubr.f32.gmra.mxu0 %v295_v1  ;;  %v351_v1 = vld [vmem:[%s3073_s26 + $0x348] sm:$0xff] }
  0xb9   : > { %2641 = vmatprep.mubr.f32.mxu0 %v296_v2 }
  0xbc   : > { %2642 = vmatmul.mubr.f32.gmra.mxu0 %v297_v3  ;;  %v352_v3 = vld [vmem:[%s3073_s26 + $0x350] sm:$0xff] }
  0xbd   : > { %2644 = vmatprep.mubr.f32.mxu0 %v298_v4 }
  0xc0   : > { %2645 = vmatmul.mubr.f32.gmra.mxu0 %v299_v5  ;;  %v353_v5 = vld [vmem:[%s3073_s26 + $0x358] sm:$0xff] }
  0xc1   : > { %2647 = vmatprep.mubr.f32.mxu0 %v300_v6 }
  0xc4   : > { %2648 = vmatmul.mubr.f32.gmra.mxu0 %v301_v7  ;;  %v354_v7 = vld [vmem:[%s3073_s26 + $0x360] sm:$0xff] }
  0xc5   : > { %2650 = vmatprep.mubr.f32.mxu0 %v302_v8 }
  0xc8   : > { %2651 = vmatmul.mubr.f32.gmra.mxu0 %v303_v9  ;;  %v355_v9 = vld [vmem:[%s3073_s26 + $0x368] sm:$0xff] }
  0xc9   : > { %2653 = vmatprep.mubr.f32.mxu0 %v304_v10 }
  0xcc   : > { %2654 = vmatmul.mubr.f32.gmra.mxu0 %v305_v11  ;;  %v356_v11 = vld [vmem:[%s3073_s26 + $0x370] sm:$0xff] }
  0xcd   : > { %2656 = vmatprep.mubr.f32.mxu0 %v306_v12 }
  0xd0   : > { %2657 = vmatmul.mubr.f32.gmra.mxu0 %v307_v13  ;;  %v357_v13 = vld [vmem:[%s3073_s26 + $0x378] sm:$0xff] }
  0xd1   : > { %2659 = vmatprep.mubr.f32.mxu0 %v308_v14 }
  0xd4   : > { %2660 = vmatmul.mubr.f32.gmra.mxu0 %v309_v15  ;;  %v358_v15 = vld [vmem:[%s3073_s26 + $0x380] sm:$0xff] }
  0xd5   : > { %2662 = vmatprep.mubr.f32.mxu0 %v310_v16 }
  0xd8   : > { %2663 = vmatmul.mubr.f32.gmra.mxu0 %v311_v17  ;;  %v359_v17 = vld [vmem:[%s3073_s26 + $0x388] sm:$0xff] }
  0xd9   : > { %2665 = vmatprep.mubr.f32.mxu0 %v312_v18 }
  0xdc   : > { %2666 = vmatmul.mubr.f32.gmra.mxu0 %v313_v19  ;;  %v360_v19 = vld [vmem:[%s3073_s26 + $0x390] sm:$0xff] }
  0xdd   : > { %2668 = vmatprep.mubr.f32.mxu0 %v314_v20 }
  0xe0   : > { %2669 = vmatmul.mubr.f32.gmra.mxu0 %v315_v21  ;;  %v361_v21 = vld [vmem:[%s3073_s26 + $0x398] sm:$0xff] }
  0xe1   : > { %2671 = vmatprep.mubr.f32.mxu0 %v316_v22 }
  0xe4   : > { %2672 = vmatmul.mubr.f32.gmra.mxu0 %v317_v23  ;;  %v362_v23 = vld [vmem:[%s3073_s26 + $0x3a0] sm:$0xff] }
  0xe5   : > { %2674 = vmatprep.mubr.f32.mxu0 %v318_v24 }
  0xe8   : > { %2675 = vmatmul.mubr.f32.gmra.mxu0 %v319_v25  ;;  %v363_v25 = vld [vmem:[%s3073_s26 + $0x3a8] sm:$0xff] }
  0xe9   : > { %2677 = vmatprep.mubr.f32.mxu0 %v320_v26 }
  0xec   : > { %2678 = vmatmul.mubr.f32.gmra.mxu0 %v321_v27  ;;  %v364_v27 = vld [vmem:[%s3073_s26 + $0x3b0] sm:$0xff] }
  0xed   : > { %2680 = vmatprep.mubr.f32.mxu0 %v322_v28 }
  0xf0   : > { %2681 = vmatmul.mubr.f32.gmra.mxu0 %v323_v29  ;;  %v365_v29 = vld [vmem:[%s3073_s26 + $0x3b8] sm:$0xff] }
  0xf1   : > { %2683 = vmatprep.mubr.f32.mxu0 %v324_v30 }
  0xf4   : > { %2684 = vmatmul.mubr.f32.gmra.mxu0 %v325_v31  ;;  %v366_v31 = vld [vmem:[%s3073_s26 + $0x3c0] sm:$0xff] }
  0xf5   : > { %2686 = vmatprep.mubr.f32.mxu0 %v326_v32 }
  0xf8   : > { %2687 = vmatmul.mubr.f32.gmra.mxu0 %v327_v33  ;;  %v367_v33 = vld [vmem:[%s3073_s26 + $0x3c8] sm:$0xff] }
  0xf9   : > { %2689 = vmatprep.mubr.f32.mxu0 %v328_v34 }
  0xfc   : > { %2690 = vmatmul.mubr.f32.gmra.mxu0 %v329_v35  ;;  %v368_v35 = vld [vmem:[%s3073_s26 + $0x3d0] sm:$0xff] }
  0xfd   : > { %2692 = vmatprep.mubr.f32.mxu0 %v330_v36 }
 0x100   : > { %2693 = vmatmul.mubr.f32.gmra.mxu0 %v331_v37  ;;  %v369_v37 = vld [vmem:[%s3073_s26 + $0x3d8] sm:$0xff] }
 0x101   : > { %2695 = vmatprep.mubr.f32.mxu0 %v332_v38 }
 0x104   : > { %2696 = vmatmul.mubr.f32.gmra.mxu0 %v333_v39  ;;  %v370_v39 = vld [vmem:[%s3073_s26 + $0x3e0] sm:$0xff] }
 0x105   : > { %2698 = vmatprep.mubr.f32.mxu0 %v334_v40 }
 0x108   : > { %2699 = vmatmul.mubr.f32.gmra.mxu0 %v335_v41  ;;  %v371_v41 = vld [vmem:[%s3073_s26 + $0x3e8] sm:$0xff] }
 0x109   : > { %2701 = vmatprep.mubr.f32.mxu0 %v336_v42 }
 0x10c   : > { %2702 = vmatmul.mubr.f32.gmra.mxu0 %v337_v43  ;;  %v372_v43 = vld [vmem:[%s3073_s26 + $0x3f0] sm:$0xff] }
 0x10d   : > { %2704 = vmatprep.mubr.f32.mxu0 %v338_v44 }
 0x110   : > { %2705 = vmatmul.mubr.f32.gmra.mxu0 %v339_v45  ;;  %v373_v45 = vld [vmem:[%s3073_s26 + $0x3f8] sm:$0xff] }
 0x111   : > { %2707 = vmatprep.mubr.f32.mxu0 %v340_v46 }
 0x114   : > { %2708 = vmatmul.mubr.f32.gmra.mxu0 %v341_v47  ;;  %v3311_v47 = vld [vmem:[%s3865_s2] ss:$0 sm:$0xff] }
 0x115   : > { %2710 = vmatprep.mubr.f32.mxu0 %v342_v48 }
 0x118   : > { %v3231_v52 = vpop.f32.mrf.mxu0  ;;  %2711 = vmatmul.mubr.f32.gmra.mxu0 %v343_v49 }
 0x119   : > { %2713 = vmatprep.mubr.f32.mxu0 %v344_v50 }
 0x11a   : > { %v3236_v54 = vpop.f32.mrf.mxu0 }
 0x11c   : > { %v3239_v56 = vpop.f32.mrf.mxu0  ;;  %2714 = vmatmul.mubr.f32.gmra.mxu0 %v345_v53 }
 0x11d   : > { %2716 = vmatprep.mubr.f32.mxu0 %v346_v55 }
 0x11e   : > { %v3242_v58 = vpop.f32.mrf.mxu0 }
 0x120   : > { %v3245_v60 = vpop.f32.mrf.mxu0  ;;  %2717 = vmatmul.mubr.f32.gmra.mxu0 %v347_v57 }
 0x121   : > { %2719 = vmatprep.mubr.f32.mxu0 %v348_v59 }
 0x122   : > { %v3248_v62 = vpop.f32.mrf.mxu0 }
 0x124   : > { %v3251_v0 = vpop.f32.mrf.mxu0  ;;  %2720 = vmatmul.mubr.f32.gmra.mxu0 %v349_v61 }
 0x125   : > { %2722 = vmatprep.mubr.f32.mxu0 %v350_v63 }
 0x126   : > { %v3254_v2 = vpop.f32.mrf.mxu0 }
 0x128   : > { %v3257_v4 = vpop.f32.mrf.mxu0  ;;  %2723 = vmatmul.mubr.f32.gmra.mxu0 %v351_v1 }
 0x129   : > { %2725 = vmatprep.mubr.f32.mxu0 %v352_v3 }
 0x12a   : > { %v3260_v6 = vpop.f32.mrf.mxu0 }
 0x12c   : > { %v3263_v8 = vpop.f32.mrf.mxu0  ;;  %2726 = vmatmul.mubr.f32.gmra.mxu0 %v353_v5 }
 0x12d   : > { %2728 = vmatprep.mubr.f32.mxu0 %v354_v7 }
 0x12e   : > { %v3266_v10 = vpop.f32.mrf.mxu0 }
 0x130   : > { %v3269_v12 = vpop.f32.mrf.mxu0  ;;  %2729 = vmatmul.mubr.f32.gmra.mxu0 %v355_v9 }
 0x131   : > { %2731 = vmatprep.mubr.f32.mxu0 %v356_v11  ;;  %v529_v7 = vadd.f32 %v3269_v12, %v3311_v47 }
 0x132   : > { %v3272_v14 = vpop.f32.mrf.mxu0 }
 0x134   : > { %v2589_v16 = vpop.f32.mrf.mxu0  ;;  %2732 = vmatmul.mubr.f32.gmra.mxu0 %v357_v13 }
 0x135   : > { %2734 = vmatprep.mubr.f32.mxu0 %v358_v15  ;;  %v539_v48 = vadd.f32 %v2589_v16, %v3311_v47 }
 0x136   : > { %v533_v18 = vpop.f32.mrf.mxu0 }
 0x137   : > { %v1117_v59 = vmax.f32 %v539_v48, 0.0  ;;  %v534_v61 = vadd.f32 %v3311_v47, %v533_v18  ;;  %v524_v18 = vadd.f32 %v3311_v47, %v3272_v14  ;;  %v504_v48 = vadd.f32 %v3311_v47, %v3260_v6 }
 0x138   : > { %v3277_v20 = vpop.f32.mrf.mxu0  ;;  %2735 = vmatmul.mubr.f32.gmra.mxu0 %v359_v17  ;;  %v1115_v17 = vmax.f32 %v529_v7, 0.0 }
 0x139   : > { %2737 = vmatprep.mubr.f32.mxu0 %v360_v19  ;;  %v1116_v9 = vmax.f32 %v534_v61, 0.0 }
 0x13a   : > { %v3280_v22 = vpop.f32.mrf.mxu0 }
 0x13c   : > { %v3283_v24 = vpop.f32.mrf.mxu0  ;;  %2738 = vmatmul.mubr.f32.gmra.mxu0 %v361_v21 }
 0x13d   : > { %2740 = vmatprep.mubr.f32.mxu0 %v362_v23 }
 0x13e   : > { %v3286_v26 = vpop.f32.mrf.mxu0 }
 0x140   : > { %v3289_v28 = vpop.f32.mrf.mxu0  ;;  %2741 = vmatmul.mubr.f32.gmra.mxu0 %v363_v25  ;;  %v519_v25 = vadd.f32 %v3263_v8, %v3311_v47 }
 0x141   : > { %2743 = vmatprep.mubr.f32.mxu0 %v364_v27  ;;  %v1114_v27 = vmax.f32 %v524_v18, 0.0 }
 0x142   : > { %v3292_v30 = vpop.f32.mrf.mxu0 }
 0x144   : > { %v3295_v32 = vpop.f32.mrf.mxu0  ;;  %2744 = vmatmul.mubr.f32.gmra.mxu0 %v365_v29 }
 0x145   : > { %2746 = vmatprep.mubr.f32.mxu0 %v366_v31 }
 0x146   : > { %v3298_v34 = vpop.f32.mrf.mxu0 }
 0x147   : > { %v574_v6 = vadd.f32 %v3311_v47, %v3298_v34  ;;  %v489_v34 = vadd.f32 %v3245_v60, %v3311_v47  ;;  %v559_v60 = vadd.f32 %v3283_v24, %v3311_v47 }
 0x148   : > { %v2604_v36 = vpop.f32.mrf.mxu0  ;;  %2747 = vmatmul.mubr.f32.gmra.mxu0 %v367_v33 }
 0x149   : > { %2749 = vmatprep.mubr.f32.mxu0 %v368_v35  ;;  %v1113_v35 = vmax.f32 %v519_v25, 0.0  ;;  %v589_v8 = vadd.f32 %v2604_v36, %v3311_v47  ;;  %v1124_v7 = vmax.f32 %v574_v6, 0.0 }
 0x14a   : > { %v3302_v38 = vpop.f32.mrf.mxu0 }
 0x14c   : > { %v2607_v40 = vpop.f32.mrf.mxu0  ;;  %2750 = vmatmul.mubr.f32.gmra.mxu0 %v369_v37  ;;  %v514_v37 = vadd.f32 %v3311_v47, %v3266_v10  ;;  %v584_v10 = vadd.f32 %v3311_v47, %v3302_v38  ;;  %v499_v38 = vadd.f32 %v3251_v0, %v3311_v47  ;;  %v569_v0 = vadd.f32 %v3289_v28, %v3311_v47 }
 0x14d   : > { %2752 = vmatprep.mubr.f32.mxu0 %v370_v39  ;;  %v599_v12 = vadd.f32 %v2607_v40, %v3311_v47  ;;  %v1107_v28 = vmax.f32 %v489_v34, 0.0 }
 0x14e   : > { %v593_v42 = vpop.f32.mrf.mxu0 }
 0x14f   : > { %v1129_v31 = vmax.f32 %v599_v12, 0.0  ;;  %v594_v14 = vadd.f32 %v3311_v47, %v593_v42  ;;  %v509_v42 = vadd.f32 %v3257_v4, %v3311_v47  ;;  %v579_v4 = vadd.f32 %v3295_v32, %v3311_v47 }
 0x150   : > { %v2610_v44 = vpop.f32.mrf.mxu0  ;;  %2753 = vmatmul.mubr.f32.gmra.mxu0 %v371_v41  ;;  %v1109_v32 = vmax.f32 %v499_v38, 0.0  ;;  %v484_v12 = vadd.f32 %v3311_v47, %v3248_v62  ;;  %v554_v62 = vadd.f32 %v3311_v47, %v3286_v26  ;;  %v469_v26 = vadd.f32 %v3231_v52, %v3311_v47 }
 0x151   : > { %2755 = vmatprep.mubr.f32.mxu0 %v372_v43  ;;  %v609_v1 = vadd.f32 %v2610_v44, %v3311_v47  ;;  %v1128_v40 = vmax.f32 %v594_v14, 0.0  ;;  %v1112_v43 = vmax.f32 %v514_v37, 0.0  ;;  %v1111_v36 = vmax.f32 %v509_v42, 0.0 }
 0x152   : > { %v603_v46 = vpop.f32.mrf.mxu0  ;;  %v1120_v42 = vmax.f32 %v554_v62, 0.0 }
 0x153   : > { %v1131_v13 = vmax.f32 %v609_v1, 0.0  ;;  %v604_v15 = vadd.f32 %v3311_v47, %v603_v46  ;;  %v494_v1 = vadd.f32 %v3311_v47, %v3254_v2  ;;  %v564_v2 = vadd.f32 %v3311_v47, %v3292_v30 }
 0x154   : > { %v2613_v49 = vpop.f32.mrf.mxu0  ;;  %2756 = vmatmul.mubr.f32.gmra.mxu0 %v373_v45  ;;  %v1127_v45 = vmax.f32 %v589_v8, 0.0  ;;  %v479_v30 = vadd.f32 %v3239_v56, %v3311_v47  ;;  %v474_v8 = vadd.f32 %v3311_v47, %v3242_v58  ;;  %v549_v56 = vadd.f32 %v3277_v20, %v3311_v47 }
 0x155   : > { %v619_v50 = vadd.f32 %v2613_v49, %v3311_v47  ;;  %v1130_v21 = vmax.f32 %v604_v15, 0.0  ;;  %v1122_v25 = vmax.f32 %v564_v2, 0.0  ;;  %v544_v58 = vadd.f32 %v3311_v47, %v3280_v22 }
 0x156   : > { %v613_v53 = vpop.f32.mrf.mxu0  ;;  %v1105_v24 = vmax.f32 %v479_v30, 0.0  ;;  %v1103_v20 = vmax.f32 %v469_v26, 0.0 }
 0x157   : > { %v1133_v55 = vmax.f32 %v619_v50, 0.0  ;;  %v614_v57 = vadd.f32 %v3311_v47, %v613_v53  ;;  %v1126_v50 = vmax.f32 %v584_v10, 0.0  ;;  %v1118_v38 = vmax.f32 %v544_v58, 0.0 }
 0x158   : > { %v3317_v63 = vpop.f32.mrf.mxu0 }
 0x159   : > { %v1132_v3 = vmax.f32 %v614_v57, 0.0  ;;  %2398 = vmatprep.subr.msk.mxu1 %vm1233_vm0, %v1133_v55  ;;  %v1110_v55 = vmax.f32 %v504_v48, 0.0 }
 0x15a   : > { %v3321_v5 = vpop.f32.mrf.mxu0  ;;  %2399 = vmatpush3.xpose.msk.msra.mxu1 %vm1233_vm0, %v1117_v59  ;;  %v1125_v59 = vmax.f32 %v579_v4, 0.0  ;;  %v464_v4 = vadd.f32 %v3311_v47, %v3236_v54 }
 0x15b   : > { %2400 = vmatprep.subr.msk.mxu1 %vm1233_vm0, %v1132_v3 }
 0x15c   : > { %v3327_v11 = vpop.f32.mrf.mxu0  ;;  %v1102_v52 = vmax.f32 %v464_v4, 0.0 }
 0x15e   : > { %v3330_v16 = vpop.f32.mrf.mxu0  ;;  %2401 = vmatpush3.xpose.msk.msra.mxu1 %vm1233_vm0, %v1116_v9 }
 0x15f   : > { %2402 = vmatprep.subr.msk.mxu1 %vm1233_vm0, %v1131_v13  ;;  %v1108_v13 = vmax.f32 %v494_v1, 0.0 }
 0x160   : > { %v3336_v19 = vpop.f32.mrf.mxu0 }
 0x162   : > { %v3339_v23 = vpop.f32.mrf.mxu0  ;;  %2403 = vmatpush3.xpose.msk.msra.mxu1 %vm1233_vm0, %v1115_v17  ;;  %v1123_v17 = vmax.f32 %v569_v0, 0.0 }
 0x163   : > { %2404 = vmatprep.subr.msk.mxu1 %vm1233_vm0, %v1130_v21 }
 0x164   : > { %v3345_v29 = vpop.f32.mrf.mxu0 }
 0x166   : > { %v3348_v33 = vpop.f32.mrf.mxu0  ;;  %2405 = vmatpush3.xpose.msk.msra.mxu1 %vm1233_vm0, %v1114_v27 }
 0x167   : > { %2406 = vmatprep.subr.msk.mxu1 %vm1233_vm0, %v1129_v31  ;;  %v1106_v31 = vmax.f32 %v484_v12, 0.0 }
 0x168   : > { %v3354_v39 = vpop.f32.mrf.mxu0 }
 0x16a   : > { %v3357_v41 = vpop.f32.mrf.mxu0  ;;  %2407 = vmatpush3.xpose.msk.msra.mxu1 %vm1233_vm0, %v1113_v35  ;;  %v1121_v35 = vmax.f32 %v559_v60, 0.0 }
 0x16b   : > { %2408 = vmatprep.subr.msk.mxu1 %vm1233_vm0, %v1128_v40 }
 0x16c   : > { %v3363_v44 = vpop.f32.mrf.mxu0 }
 0x16e   : > { %v3367_v46 = vpop.f32.mrf.mxu0  ;;  %2409 = vmatpush3.xpose.msk.msra.mxu1 %vm1233_vm0, %v1112_v43 }
 0x16f   : > { %2410 = vmatprep.subr.msk.mxu1 %vm1233_vm0, %v1127_v45  ;;  %v1104_v45 = vmax.f32 %v474_v8, 0.0  ;;  %v679_v8 = vadd.f32 %v3363_v44, %v3311_v47 }
 0x170   : > { %v3373_v49 = vpop.f32.mrf.mxu0 }
 0x172   : > { %v3377_v53 = vpop.f32.mrf.mxu0  ;;  %2411 = vmatpush3.xpose.msk.msra.mxu1 %vm1233_vm0, %v1111_v36  ;;  %v1119_v36 = vmax.f32 %v549_v56, 0.0 }
 0x173   : > { %2412 = vmatprep.subr.msk.mxu1 %vm1233_vm0, %v1126_v50 }
 0x174   : > { %v2637_v57 = vpop.f32.mrf.mxu0 }
 0x176   : > { %v3385_v61 = vpop.f32.mrf.mxu0  ;;  %2413 = vmatpush3.xpose.msk.msra.mxu1 %vm1233_vm0, %v1110_v55 }
 0x177   : > { %2414 = vmatprep.subr.msk.mxu1 %vm1233_vm0, %v1125_v59  ;;  %v699_v59 = vadd.f32 %v2637_v57, %v3311_v47 }
 0x178   : > { %v3391_v3 = vpop.f32.mrf.mxu0 }
 0x179   : > { %v1149_v54 = vmax.f32 %v699_v59, 0.0  ;;  %v664_v59 = vadd.f32 %v3311_v47, %v3357_v41 }
 0x17a   : > { %v3395_v9 = vpop.f32.mrf.mxu0  ;;  %2415 = vmatpush3.xpose.msk.msra.mxu1 %vm1233_vm0, %v1109_v32 }
 0x17b   : > { %2416 = vmatprep.subr.msk.mxu1 %vm1233_vm0, %v1124_v7  ;;  %v694_v7 = vadd.f32 %v3311_v47, %v3385_v61  ;;  %v689_v61 = vadd.f32 %v3373_v49, %v3311_v47 }
 0x17c   : > { %v3401_v15 = vpop.f32.mrf.mxu0 }
 0x17d   : > { %v1148_v2 = vmax.f32 %v694_v7, 0.0  ;;  %v1147_v30 = vmax.f32 %v689_v61, 0.0 }
 0x17e   : > { %v3405_v18 = vpop.f32.mrf.mxu0  ;;  %2417 = vmatpush3.xpose.msk.msra.mxu1 %vm1233_vm0, %v1108_v13 }
 0x17f   : > { %2418 = vmatprep.subr.msk.mxu1 %vm1233_vm0, %v1123_v17 }
 0x180   : > { %v3411_v21 = vpop.f32.mrf.mxu0 }
 0x182   : > { %v3415_v27 = vpop.f32.mrf.mxu0  ;;  %2419 = vmatpush3.xpose.msk.msra.mxu1 %vm1233_vm0, %v1107_v28 }
 0x183   : > { %2420 = vmatprep.subr.msk.mxu1 %vm1233_vm0, %v1122_v25 }
 0x184   : > { %v3421_v14 = vpop.f32.mrf.mxu0 }
 0x186   : > { %v3425_v37 = vpop.f32.mrf.mxu0  ;;  %2421 = vmatpush3.xpose.msk.msra.mxu1 %vm1233_vm0, %v1106_v31  ;;  %v684_v31 = vadd.f32 %v3311_v47, %v3377_v53 }
 0x187   : > { %2422 = vmatprep.subr.msk.mxu1 %vm1233_vm0, %v1121_v35  ;;  %v734_v41 = vadd.f32 %v3311_v47, %v3425_v37  ;;  %v649_v37 = vadd.f32 %v3336_v19, %v3311_v47  ;;  %v719_v19 = vadd.f32 %v3401_v15, %v3311_v47 }
 0x188   : > { %v3431_v40 = vpop.f32.mrf.mxu0  ;;  %v1146_v56 = vmax.f32 %v684_v31, 0.0 }
 0x189   : > { %v749_v44 = vadd.f32 %v3431_v40, %v3311_v47  ;;  %v1156_v61 = vmax.f32 %v734_v41, 0.0 }
 0x18a   : > { %v3435_v43 = vpop.f32.mrf.mxu0  ;;  %2423 = vmatpush3.xpose.msk.msra.mxu1 %vm1233_vm0, %v1105_v24 }
 0x18b   : > { %2424 = vmatprep.subr.msk.mxu1 %vm1233_vm0, %v1120_v42 }
 0x18c   : > { %v2655_v10 = vpop.f32.mrf.mxu0 }
 0x18d   : > { %v759_v49 = vadd.f32 %v2655_v10, %v3311_v47  ;;  %v1145_v10 = vmax.f32 %v679_v8, 0.0 }
 0x18e   : > { %v753_v48 = vpop.f32.mrf.mxu0  ;;  %2425 = vmatpush3.xpose.msk.msra.mxu1 %vm1233_vm0, %v1104_v45 }
 0x18f   : > { %2426 = vmatprep.subr.msk.mxu1 %vm1233_vm0, %v1119_v36  ;;  %v1161_v26 = vmax.f32 %v759_v49, 0.0  ;;  %v754_v53 = vadd.f32 %v3311_v47, %v753_v48  ;;  %v674_v36 = vadd.f32 %v3311_v47, %v3367_v46  ;;  %v669_v48 = vadd.f32 %v3354_v39, %v3311_v47 }
 0x190   : > { %v2658_v50 = vpop.f32.mrf.mxu0  ;;  %v744_v46 = vadd.f32 %v3311_v47, %v3435_v43  ;;  %v739_v39 = vadd.f32 %v3421_v14, %v3311_v47  ;;  %v659_v43 = vadd.f32 %v3345_v29, %v3311_v47  ;;  %v729_v29 = vadd.f32 %v3411_v21, %v3311_v47 }
 0x191   : > { %v769_v13 = vadd.f32 %v2658_v50, %v3311_v47  ;;  %v1144_v50 = vmax.f32 %v674_v36, 0.0  ;;  %v1143_v40 = vmax.f32 %v669_v48, 0.0  ;;  %v1139_v21 = vmax.f32 %v649_v37, 0.0 }
 0x192   : > { %v763_v55 = vpop.f32.mrf.mxu0  ;;  %2427 = vmatpush3.xpose.msk.msra.mxu1 %vm1233_vm0, %v1103_v20  ;;  %v1160_v20 = vmax.f32 %v754_v53, 0.0  ;;  %v1141_v14 = vmax.f32 %v659_v43, 0.0  ;;  %v644_v49 = vadd.f32 %v3311_v47, %v3339_v23  ;;  %v714_v23 = vadd.f32 %v3311_v47, %v3405_v18 }
 0x193   : > { %2428 = vmatprep.subr.msk.mxu1 %vm1233_vm0, %v1118_v38  ;;  %v1163_v12 = vmax.f32 %v769_v13, 0.0  ;;  %v764_v60 = vadd.f32 %v3311_v47, %v763_v55  ;;  %v1159_v55 = vmax.f32 %v749_v44, 0.0  ;;  %v654_v13 = vadd.f32 %v3311_v47, %v3348_v33 }
 0x194   : > { %v2661_v22 = vpop.f32.mrf.mxu0  ;;  %v724_v33 = vadd.f32 %v3311_v47, %v3415_v27  ;;  %v639_v27 = vadd.f32 %v3327_v11, %v3311_v47  ;;  %v634_v44 = vadd.f32 %v3311_v47, %v3330_v16  ;;  %v709_v11 = vadd.f32 %v3391_v3, %v3311_v47 }
 0x195   : > { %v779_v6 = vadd.f32 %v2661_v22, %v3311_v47  ;;  %v1162_v62 = vmax.f32 %v764_v60, 0.0  ;;  %v1152_v48 = vmax.f32 %v714_v23, 0.0  ;;  %v629_v18 = vadd.f32 %v3317_v63, %v3311_v47 }
 0x196   : > { %v773_v32 = vpop.f32.mrf.mxu0  ;;  %2429 = vmatpush3.xpose.msk.msra.mxu1 %vm1233_vm0, %v1102_v52  ;;  %v1154_v8 = vmax.f32 %v724_v33, 0.0  ;;  %v1137_v15 = vmax.f32 %v639_v27, 0.0  ;;  %v704_v16 = vadd.f32 %v3311_v47, %v3395_v9 }
 0x197   : > { %v1165_v1 = vmax.f32 %v779_v6, 0.0  ;;  %v774_v0 = vadd.f32 %v3311_v47, %v773_v32  ;;  %v1158_v6 = vmax.f32 %v744_v46, 0.0  ;;  %v1135_v3 = vmax.f32 %v629_v18, 0.0 }
 0x198   : > { %v3455_v34 = vpop.f32.mrf.mxu0  ;;  %v1150_v43 = vmax.f32 %v704_v16, 0.0 }
 0x199   : > { %v1164_v17 = vmax.f32 %v774_v0, 0.0  ;;  %2431 = vmatmul.mubr.msk.f32.vlgmr.msra.gmra.mxu1 %vm1233_vm0, %v3229_v51  ;;  %2432 = vmatprep.subr.msk.mxu1 %vm1233_vm0, %v1165_v1  ;;  %v1142_v1 = vmax.f32 %v664_v59, 0.0 }
 0x19a   : > { %v3461_v57 = vpop.f32.mrf.mxu0  ;;  %2433 = vmatpush3.xpose.msk.msra.mxu1 %vm1233_vm0, %v1149_v54  ;;  %2464 = vmatprep.mubr.msk.f32.mxu1 %vm1233_vm0, %v3229_v51  ;;  %v1157_v54 = vmax.f32 %v739_v39, 0.0  ;;  %v624_v39 = vadd.f32 %v3311_v47, %v3321_v5 }
 0x19b   : > { %2434 = vmatprep.subr.msk.mxu1 %vm1233_vm0, %v1164_v17 }
 0x19c   : > { %v3469_v28 = vpop.f32.mrf.mxu0  ;;  %v1134_v63 = vmax.f32 %v624_v39, 0.0 }
 0x19e   : > { %v3472_v25 = vpop.f32.mrf.mxu0  ;;  %2435 = vmatpush3.xpose.msk.msra.mxu1 %vm1233_vm0, %v1148_v2 }
 0x19f   : > { %2436 = vmatprep.subr.msk.mxu1 %vm1233_vm0, %v1163_v12  ;;  %v1140_v12 = vmax.f32 %v654_v13, 0.0 }
 0x1a0   : > { %v3478_v35 = vpop.f32.mrf.mxu0 }
 0x1a2   : > { %v3481_v24 = vpop.f32.mrf.mxu0  ;;  %2437 = vmatpush3.xpose.msk.msra.mxu1 %vm1233_vm0, %v1147_v30  ;;  %v1155_v30 = vmax.f32 %v729_v29, 0.0 }
 0x1a3   : > { %2438 = vmatprep.subr.msk.mxu1 %vm1233_vm0, %v1162_v62 }
 0x1a4   : > { %v3487_v42 = vpop.f32.mrf.mxu0 }
 0x1a6   : > { %v3490_v45 = vpop.f32.mrf.mxu0  ;;  %2439 = vmatpush3.xpose.msk.msra.mxu1 %vm1233_vm0, %v1146_v56 }
 0x1a7   : > { %2440 = vmatprep.subr.msk.mxu1 %vm1233_vm0, %v1161_v26  ;;  %v1138_v26 = vmax.f32 %v644_v49, 0.0 }
 0x1a8   : > { %v3496_v58 = vpop.f32.mrf.mxu0 }
 0x1aa   : > { %v3500_v4 = vpop.f32.mrf.mxu0  ;;  %2441 = vmatpush3.xpose.msk.msra.mxu1 %vm1233_vm0, %v1145_v10  ;;  %v1153_v10 = vmax.f32 %v719_v19, 0.0 }
 0x1ab   : > { %2442 = vmatprep.subr.msk.mxu1 %vm1233_vm0, %v1160_v20 }
 0x1ac   : > { %v3506_v38 = vpop.f32.mrf.mxu0 }
 0x1ae   : > { %v3510_v52 = vpop.f32.mrf.mxu0  ;;  %2443 = vmatpush3.xpose.msk.msra.mxu1 %vm1233_vm0, %v1144_v50 }
 0x1af   : > { %2444 = vmatprep.subr.msk.mxu1 %vm1233_vm0, %v1159_v55  ;;  %v1136_v55 = vmax.f32 %v634_v44, 0.0  ;;  %v839_v44 = vadd.f32 %v3506_v38, %v3311_v47 }
 0x1b0   : > { %v3516_v22 = vpop.f32.mrf.mxu0 }
 0x1b2   : > { %v3520_v32 = vpop.f32.mrf.mxu0  ;;  %2445 = vmatpush3.xpose.msk.msra.mxu1 %vm1233_vm0, %v1143_v40  ;;  %v1151_v40 = vmax.f32 %v709_v11, 0.0 }
 0x1b3   : > { %2446 = vmatprep.subr.msk.mxu1 %vm1233_vm0, %v1158_v6 }
 0x1b4   : > { %v2685_v0 = vpop.f32.mrf.mxu0 }
 0x1b6   : > { %v3528_v7 = vpop.f32.mrf.mxu0  ;;  %2447 = vmatpush3.xpose.msk.msra.mxu1 %vm1233_vm0, %v1142_v1 }
 0x1b7   : > { %2448 = vmatprep.subr.msk.mxu1 %vm1233_vm0, %v1157_v54  ;;  %v859_v54 = vadd.f32 %v2685_v0, %v3311_v47 }
 0x1b8   : > { %v3534_v17 = vpop.f32.mrf.mxu0 }
 0x1b9   : > { %v1181_v5 = vmax.f32 %v859_v54, 0.0  ;;  %v824_v54 = vadd.f32 %v3311_v47, %v3500_v4 }
 0x1ba   : > { %v3538_v2 = vpop.f32.mrf.mxu0  ;;  %2449 = vmatpush3.xpose.msk.msra.mxu1 %vm1233_vm0, %v1141_v14 }
 0x1bb   : > { %2450 = vmatprep.subr.msk.mxu1 %vm1233_vm0, %v1156_v61  ;;  %v854_v61 = vadd.f32 %v3311_v47, %v3528_v7  ;;  %v849_v7 = vadd.f32 %v3516_v22, %v3311_v47 }
 0x1bc   : > { %v3544_v60 = vpop.f32.mrf.mxu0 }
 0x1bd   : > { %v1180_v33 = vmax.f32 %v854_v61, 0.0  ;;  %v1179_v27 = vmax.f32 %v849_v7, 0.0 }
 0x1be   : > { %v3548_v31 = vpop.f32.mrf.mxu0  ;;  %2451 = vmatpush3.xpose.msk.msra.mxu1 %vm1233_vm0, %v1140_v12 }
 0x1bf   : > { %2452 = vmatprep.subr.msk.mxu1 %vm1233_vm0, %v1155_v30 }
 0x1c0   : > { %v3554_v62 = vpop.f32.mrf.mxu0 }
 0x1c2   : > { %v3558_v56 = vpop.f32.mrf.mxu0  ;;  %2453 = vmatpush3.xpose.msk.msra.mxu1 %vm1233_vm0, %v1139_v21 }
 0x1c3   : > { %2454 = vmatprep.subr.msk.mxu1 %vm1233_vm0, %v1154_v8 }
 0x1c4   : > { %v3564_v53 = vpop.f32.mrf.mxu0 }
 0x1c6   : > { %v3568_v36 = vpop.f32.mrf.mxu0  ;;  %2455 = vmatpush3.xpose.msk.msra.mxu1 %vm1233_vm0, %v1138_v26  ;;  %v844_v26 = vadd.f32 %v3311_v47, %v3520_v32 }
 0x1c7   : > { %2456 = vmatprep.subr.msk.mxu1 %vm1233_vm0, %v1153_v10  ;;  %v894_v4 = vadd.f32 %v3311_v47, %v3568_v36  ;;  %v809_v36 = vadd.f32 %v3478_v35, %v3311_v47  ;;  %v879_v35 = vadd.f32 %v3544_v60, %v3311_v47 }
 0x1c8   : > { %v3574_v20 = vpop.f32.mrf.mxu0  ;;  %v1178_v11 = vmax.f32 %v844_v26, 0.0 }
 0x1c9   : > { %v909_v38 = vadd.f32 %v3574_v20, %v3311_v47  ;;  %v1188_v7 = vmax.f32 %v894_v4, 0.0 }
 0x1ca   : > { %v3578_v50 = vpop.f32.mrf.mxu0  ;;  %2457 = vmatpush3.xpose.msk.msra.mxu1 %vm1233_vm0, %v1137_v15 }
 0x1cb   : > { %2458 = vmatprep.subr.msk.mxu1 %vm1233_vm0, %v1152_v48 }
 0x1cc   : > { %v2703_v46 = vpop.f32.mrf.mxu0 }
 0x1cd   : > { %v919_v22 = vadd.f32 %v2703_v46, %v3311_v47  ;;  %v1177_v46 = vmax.f32 %v839_v44, 0.0 }
 0x1ce   : > { %v913_v59 = vpop.f32.mrf.mxu0  ;;  %2459 = vmatpush3.xpose.msk.msra.mxu1 %vm1233_vm0, %v1136_v55 }
 0x1cf   : > { %2460 = vmatprep.subr.msk.mxu1 %vm1233_vm0, %v1151_v40  ;;  %v1193_v18 = vmax.f32 %v919_v22, 0.0  ;;  %v914_v32 = vadd.f32 %v3311_v47, %v913_v59  ;;  %v834_v40 = vadd.f32 %v3311_v47, %v3510_v52  ;;  %v829_v59 = vadd.f32 %v3496_v58, %v3311_v47 }
 0x1d0   : > { %v2706_v6 = vpop.f32.mrf.mxu0  ;;  %v904_v52 = vadd.f32 %v3311_v47, %v3578_v50  ;;  %v899_v58 = vadd.f32 %v3564_v53, %v3311_v47  ;;  %v819_v50 = vadd.f32 %v3487_v42, %v3311_v47  ;;  %v889_v42 = vadd.f32 %v3554_v62, %v3311_v47 }
 0x1d1   : > { %v929_v12 = vadd.f32 %v2706_v6, %v3311_v47  ;;  %v1176_v6 = vmax.f32 %v834_v40, 0.0  ;;  %v1175_v20 = vmax.f32 %v829_v59, 0.0  ;;  %v1171_v62 = vmax.f32 %v809_v36, 0.0 }
 0x1d2   : > { %v923_v1 = vpop.f32.mrf.mxu0  ;;  %2461 = vmatpush3.xpose.msk.msra.mxu1 %vm1233_vm0, %v1135_v3  ;;  %v1192_v3 = vmax.f32 %v914_v32, 0.0  ;;  %v1173_v53 = vmax.f32 %v819_v50, 0.0  ;;  %v804_v22 = vadd.f32 %v3311_v47, %v3481_v24  ;;  %v874_v24 = vadd.f32 %v3311_v47, %v3548_v31 }
 0x1d3   : > { %2462 = vmatprep.subr.msk.mxu1 %vm1233_vm0, %v1150_v43  ;;  %v1195_v49 = vmax.f32 %v929_v12, 0.0  ;;  %v924_v19 = vadd.f32 %v3311_v47, %v923_v1  ;;  %v1191_v1 = vmax.f32 %v909_v38, 0.0  ;;  %v814_v12 = vadd.f32 %v3311_v47, %v3490_v45 }
 0x1d4   : > { %v2709_v9 = vpop.f32.mrf.mxu0  ;;  %v884_v45 = vadd.f32 %v3311_v47, %v3558_v56  ;;  %v799_v56 = vadd.f32 %v3469_v28, %v3311_v47  ;;  %v794_v38 = vadd.f32 %v3311_v47, %v3472_v25  ;;  %v869_v28 = vadd.f32 %v3534_v17, %v3311_v47 }
 0x1d5   : > { %v939_v41 = vadd.f32 %v2709_v9, %v3311_v47  ;;  %v1194_v23 = vmax.f32 %v924_v19, 0.0  ;;  %v1184_v59 = vmax.f32 %v874_v24, 0.0  ;;  %v789_v31 = vadd.f32 %v3455_v34, %v3311_v47 }
 0x1d6   : > { %v933_v14 = vpop.f32.mrf.mxu0  ;;  %2463 = vmatpush3.xpose.msk.msra.mxu1 %vm1233_vm0, %v1134_v63  ;;  %v1186_v44 = vmax.f32 %v884_v45, 0.0  ;;  %v1169_v60 = vmax.f32 %v799_v56, 0.0 }
 0x1d7   : > { %v1197_v13 = vmax.f32 %v939_v41, 0.0  ;;  %v934_v29 = vadd.f32 %v3311_v47, %v933_v14  ;;  %v1190_v41 = vmax.f32 %v904_v52, 0.0  ;;  %v1167_v17 = vmax.f32 %v789_v31, 0.0 }
 0x1d8   : > { %v3598_v37 = vpop.f32.mrf.mxu0 }
 0x1d9   : > { %v1196_v30 = vmax.f32 %v934_v29, 0.0  ;;  %2465 = vmatmul.mubr.msk.f32.vlgmr.msra.gmra.mxu1 %vm1233_vm0, %v3229_v51  ;;  %2466 = vmatprep.subr.msk.mxu1 %vm1233_vm0, %v1197_v13  ;;  %v1174_v13 = vmax.f32 %v824_v54, 0.0  ;;  %v864_v54 = vadd.f32 %v3311_v47, %v3538_v2 }
 0x1da   : > { %v3604_v0 = vpop.f32.mrf.mxu0  ;;  %2467 = vmatpush3.xpose.msk.msra.mxu1 %vm1233_vm0, %v1181_v5  ;;  %2498 = vmatprep.mubr.msk.f32.mxu1 %vm1233_vm0, %v3229_v51  ;;  %v1189_v5 = vmax.f32 %v899_v58, 0.0  ;;  %v784_v58 = vadd.f32 %v3311_v47, %v3461_v57 }
 0x1db   : > { %2468 = vmatprep.subr.msk.mxu1 %vm1233_vm0, %v1196_v30  ;;  %v1182_v50 = vmax.f32 %v864_v54, 0.0 }
 0x1dc   : > { %v3612_v21 = vpop.f32.mrf.mxu0  ;;  %v1166_v34 = vmax.f32 %v784_v58, 0.0 }
 0x1de   : > { %v3615_v8 = vpop.f32.mrf.mxu0  ;;  %2469 = vmatpush3.xpose.msk.msra.mxu1 %vm1233_vm0, %v1180_v33 }
 0x1df   : > { %2470 = vmatprep.subr.msk.mxu1 %vm1233_vm0, %v1195_v49  ;;  %v1172_v49 = vmax.f32 %v814_v12, 0.0 }
 0x1e0   : > { %v3621_v10 = vpop.f32.mrf.mxu0 }
 0x1e2   : > { %v3624_v15 = vpop.f32.mrf.mxu0  ;;  %2471 = vmatpush3.xpose.msk.msra.mxu1 %vm1233_vm0, %v1179_v27  ;;  %v1187_v27 = vmax.f32 %v889_v42, 0.0 }
 0x1e3   : > { %2472 = vmatprep.subr.msk.mxu1 %vm1233_vm0, %v1194_v23 }
 0x1e4   : > { %v3630_v48 = vpop.f32.mrf.mxu0 }
 0x1e6   : > { %v3633_v55 = vpop.f32.mrf.mxu0  ;;  %2473 = vmatpush3.xpose.msk.msra.mxu1 %vm1233_vm0, %v1178_v11 }
 0x1e7   : > { %2474 = vmatprep.subr.msk.mxu1 %vm1233_vm0, %v1193_v18  ;;  %v1170_v18 = vmax.f32 %v804_v22, 0.0 }
 0x1e8   : > { %v3639_v16 = vpop.f32.mrf.mxu0 }
 0x1ea   : > { %v3643_v39 = vpop.f32.mrf.mxu0  ;;  %2475 = vmatpush3.xpose.msk.msra.mxu1 %vm1233_vm0, %v1177_v46  ;;  %v1185_v46 = vmax.f32 %v879_v35, 0.0 }
 0x1eb   : > { %2476 = vmatprep.subr.msk.mxu1 %vm1233_vm0, %v1192_v3 }
 0x1ec   : > { %v3649_v43 = vpop.f32.mrf.mxu0 }
 0x1ee   : > { %v3653_v63 = vpop.f32.mrf.mxu0  ;;  %2477 = vmatpush3.xpose.msk.msra.mxu1 %vm1233_vm0, %v1176_v6 }
 0x1ef   : > { %2478 = vmatprep.subr.msk.mxu1 %vm1233_vm0, %v1191_v1  ;;  %v1168_v1 = vmax.f32 %v794_v38, 0.0 }
 0x1f0   : > { %v3659_v9 = vpop.f32.mrf.mxu0 }
 0x1f2   : > { %v3663_v14 = vpop.f32.mrf.mxu0  ;;  %2479 = vmatpush3.xpose.msk.msra.mxu1 %vm1233_vm0, %v1175_v20  ;;  %v1183_v20 = vmax.f32 %v869_v28, 0.0 }
 0x1f3   : > { %2480 = vmatprep.subr.msk.mxu1 %vm1233_vm0, %v1190_v41  ;;  %v1004_v22 = vadd.f32 %v3311_v47, %v3663_v14  ;;  %v994_v14 = vadd.f32 %v3311_v47, %v3653_v63  ;;  %v984_v63 = vadd.f32 %v3311_v47, %v3643_v39 }
 0x1f4   : > { %v2733_v29 = vpop.f32.mrf.mxu0 }
 0x1f5   : > { %v1208_v38 = vmax.f32 %v994_v14, 0.0 }
 0x1f6   : > { %v3671_v61 = vpop.f32.mrf.mxu0  ;;  %2481 = vmatpush3.xpose.msk.msra.mxu1 %vm1233_vm0, %v1174_v13 }
 0x1f7   : > { %2482 = vmatprep.subr.msk.mxu1 %vm1233_vm0, %v1189_v5  ;;  %v1019_v5 = vadd.f32 %v2733_v29, %v3311_v47  ;;  %v1009_v29 = vadd.f32 %v3659_v9, %v3311_v47  ;;  %v999_v9 = vadd.f32 %v3649_v43, %v3311_v47  ;;  %v989_v43 = vadd.f32 %v3639_v16, %v3311_v47 }
 0x1f8   : > { %v3677_v30 = vpop.f32.mrf.mxu0  ;;  %v979_v16 = vadd.f32 %v3630_v48, %v3311_v47  ;;  %v969_v48 = vadd.f32 %v3621_v10, %v3311_v47  ;;  %v959_v10 = vadd.f32 %v3612_v21, %v3311_v47  ;;  %v949_v21 = vadd.f32 %v3598_v37, %v3311_v47  ;;  %v2839_v37 = vld [vmem:[%s3866_s3] sm:$0x1] }
 0x1f9   : > { %v1213_v57 = vmax.f32 %v1019_v5, 0.0  ;;  %v1207_v31 = vmax.f32 %v989_v43, 0.0  ;;  %v1029_v5 = vadd.f32 %v3677_v30, %v3311_v47  ;;  %v944_v30 = vadd.f32 %v3311_v47, %v3604_v0 }
 0x1fa   : > { %v3681_v33 = vpop.f32.mrf.mxu0  ;;  %2483 = vmatpush3.xpose.msk.msra.mxu1 %vm1233_vm0, %v1173_v53  ;;  %v1205_v39 = vmax.f32 %v979_v16, 0.0  ;;  %v1232_v0 = vstv %s1231_s30 }
 0x1fb   : > { %2484 = vmatprep.subr.msk.mxu1 %vm1233_vm0, %v1188_v7  ;;  %v1014_v7 = vadd.f32 %v3311_v47, %v3671_v61 }
 0x1fc   : > { %v3687_v19 = vpop.f32.mrf.mxu0 }
 0x1fe   : > { %v3691_v26 = vpop.f32.mrf.mxu0  ;;  %2485 = vmatpush3.xpose.msk.msra.mxu1 %vm1233_vm0, %v1172_v49 }
 0x1ff   : > { %2486 = vmatprep.subr.msk.mxu1 %vm1233_vm0, %v1187_v27  ;;  %v1212_v27 = vmax.f32 %v1014_v7, 0.0 }
 0x200   : > { %v3697_v23 = vpop.f32.mrf.mxu0 }
 0x201   : > { %v1049_v54 = vadd.f32 %v3697_v23, %v3311_v47  ;;  %v964_v23 = vadd.f32 %v3311_v47, %v3624_v15  ;;  %v1201_v15 = vmax.f32 %v959_v10, 0.0 }
 0x202   : > { %v3701_v11 = vpop.f32.mrf.mxu0  ;;  %2487 = vmatpush3.xpose.msk.msra.mxu1 %vm1233_vm0, %v1171_v62  ;;  %v1211_v62 = vmax.f32 %v1009_v29, 0.0 }
 0x203   : > { %2488 = vmatprep.subr.msk.mxu1 %vm1233_vm0, %v1186_v44  ;;  %v1210_v44 = vmax.f32 %v1004_v22, 0.0  ;;  %v1044_v58 = vadd.f32 %v3311_v47, %v3701_v11  ;;  %v1202_v11 = vmax.f32 %v964_v23, 0.0 }
 0x204   : > { %v3707_v32 = vpop.f32.mrf.mxu0 }
 0x206   : > { %v3711_v40 = vpop.f32.mrf.mxu0  ;;  %2489 = vmatpush3.xpose.msk.msra.mxu1 %vm1233_vm0, %v1170_v18 }
 0x207   : > { %2490 = vmatprep.subr.msk.mxu1 %vm1233_vm0, %v1185_v46  ;;  %v1209_v46 = vmax.f32 %v999_v9, 0.0 }
 0x208   : > { %v2748_v3 = vpop.f32.mrf.mxu0 }
 0x209   : > { %v1069_v24 = vadd.f32 %v2748_v3, %v3311_v47  ;;  %v1059_v3 = vadd.f32 %v3707_v32, %v3311_v47  ;;  %v974_v32 = vadd.f32 %v3311_v47, %v3633_v55  ;;  %v1203_v55 = vmax.f32 %v969_v48, 0.0 }
 0x20a   : > { %v1063_v6 = vpop.f32.mrf.mxu0  ;;  %2491 = vmatpush3.xpose.msk.msra.mxu1 %vm1233_vm0, %v1169_v60 }
 0x20b   : > { %2492 = vmatprep.subr.msk.mxu1 %vm1233_vm0, %v1184_v59  ;;  %v1223_v28 = vmax.f32 %v1069_v24, 0.0  ;;  %v1064_v59 = vadd.f32 %v3311_v47, %v1063_v6  ;;  %v1206_v6 = vmax.f32 %v984_v63, 0.0 }
 0x20c   : > { %v2751_v52 = vpop.f32.mrf.mxu0 }
 0x20d   : > { %v1079_v35 = vadd.f32 %v2751_v52, %v3311_v47  ;;  %v1221_v52 = vmax.f32 %v1059_v3, 0.0 }
 0x20e   : > { %v1073_v25 = vpop.f32.mrf.mxu0  ;;  %2493 = vmatpush3.xpose.msk.msra.mxu1 %vm1233_vm0, %v1168_v1  ;;  %v1222_v1 = vmax.f32 %v1064_v59, 0.0 }
 0x20f   : > { %2494 = vmatprep.subr.msk.mxu1 %vm1233_vm0, %v1183_v20  ;;  %v1225_v56 = vmax.f32 %v1079_v35, 0.0  ;;  %v1074_v18 = vadd.f32 %v3311_v47, %v1073_v25  ;;  %v1054_v20 = vadd.f32 %v3311_v47, %v3711_v40  ;;  %v1204_v40 = vmax.f32 %v974_v32, 0.0 }
 0x210   : > { %v2754_v41 = vpop.f32.mrf.mxu0 }
 0x211   : > { %v1089_v36 = vadd.f32 %v2754_v41, %v3311_v47  ;;  %v1224_v60 = vmax.f32 %v1074_v18, 0.0  ;;  %v1220_v25 = vmax.f32 %v1054_v20, 0.0  ;;  %v1039_v41 = vadd.f32 %v3687_v19, %v3311_v47 }
 0x212   : > { %v1083_v13 = vpop.f32.mrf.mxu0  ;;  %2495 = vmatpush3.xpose.msk.msra.mxu1 %vm1233_vm0, %v1167_v17  ;;  %v1219_v17 = vmax.f32 %v1049_v54, 0.0  ;;  %v954_v19 = vadd.f32 %v3311_v47, %v3615_v8  ;;  %v1199_v8 = vmax.f32 %v949_v21, 0.0 }
 0x213   : > { %2496 = vmatprep.subr.msk.mxu1 %vm1233_vm0, %v1182_v50  ;;  %v1227_v61 = vmax.f32 %v1089_v36, 0.0  ;;  %v1084_v45 = vadd.f32 %v3311_v47, %v1083_v13  ;;  %v1218_v50 = vmax.f32 %v1044_v58, 0.0  ;;  %v1217_v13 = vmax.f32 %v1039_v41, 0.0 }
 0x214   : > { %v2757_v2 = vpop.f32.mrf.mxu0 }
 0x215   : > { %v1099_v4 = vadd.f32 %v2757_v2, %v3311_v47 }
 0x216   : > { %v1093_v53 = vpop.f32.mrf.mxu0  ;;  %2497 = vmatpush3.xpose.msk.msra.mxu1 %vm1233_vm0, %v1166_v34  ;;  %v1034_v34 = vadd.f32 %v3311_v47, %v3691_v26  ;;  %v1200_v26 = vmax.f32 %v954_v19, 0.0 }
 0x217   : > { %v1229_v12 = vmax.f32 %v1099_v4, 0.0  ;;  %v1094_v42 = vadd.f32 %v3311_v47, %v1093_v53  ;;  %v1215_v4 = vmax.f32 %v1029_v5, 0.0  ;;  %v1024_v53 = vadd.f32 %v3311_v47, %v3681_v33 }
 0x218   : > { %v1216_v2 = vmax.f32 %v1034_v34, 0.0 }
 0x219   : > { %v1228_v49 = vmax.f32 %v1094_v42, 0.0  ;;  %2499 = vmatmul.mubr.msk.f32.vlgmr.msra.gmra.mxu1 %vm1233_vm0, %v3229_v51  ;;  %2500 = vmatprep.subr.msk.mxu1 %vm1233_vm0, %v1229_v12  ;;  %v1214_v12 = vmax.f32 %v1024_v53, 0.0  ;;  %v1198_v42 = vmax.f32 %v944_v30, 0.0 }
 0x21a   : > { %2501 = vmatpush3.xpose.msk.msra.mxu1 %vm1233_vm0, %v1213_v57  ;;  %2532 = vmatprep.mubr.msk.f32.mxu1 %vm1233_vm0, %v3229_v51  ;;  %v1226_v51 = vmax.f32 %v1084_v45, 0.0 }
 0x21b   : > { %2502 = vmatprep.subr.msk.mxu1 %vm1233_vm0, %v1228_v49 }
 0x21e   : > { %2503 = vmatpush3.xpose.msk.msra.mxu1 %vm1233_vm0, %v1212_v27 }
 0x21f   : > { %2504 = vmatprep.subr.msk.mxu1 %vm1233_vm0, %v1227_v61 }
 0x222   : > { %2505 = vmatpush3.xpose.msk.msra.mxu1 %vm1233_vm0, %v1211_v62 }
 0x223   : > { %2506 = vmatprep.subr.msk.mxu1 %vm1233_vm0, %v1226_v51 }
 0x226   : > { %2507 = vmatpush3.xpose.msk.msra.mxu1 %vm1233_vm0, %v1210_v44 }
 0x227   : > { %2508 = vmatprep.subr.msk.mxu1 %vm1233_vm0, %v1225_v56 }
 0x22a   : > { %2509 = vmatpush3.xpose.msk.msra.mxu1 %vm1233_vm0, %v1209_v46 }
 0x22b   : > { %2510 = vmatprep.subr.msk.mxu1 %vm1233_vm0, %v1224_v60 }
 0x22e   : > { %2511 = vmatpush3.xpose.msk.msra.mxu1 %vm1233_vm0, %v1208_v38 }
 0x22f   : > { %2512 = vmatprep.subr.msk.mxu1 %vm1233_vm0, %v1223_v28 }
 0x232   : > { %2513 = vmatpush3.xpose.msk.msra.mxu1 %vm1233_vm0, %v1207_v31 }
 0x233   : > { %2514 = vmatprep.subr.msk.mxu1 %vm1233_vm0, %v1222_v1 }
 0x236   : > { %2515 = vmatpush3.xpose.msk.msra.mxu1 %vm1233_vm0, %v1206_v6 }
 0x237   : > { %2516 = vmatprep.subr.msk.mxu1 %vm1233_vm0, %v1221_v52 }
 0x23a   : > { %2517 = vmatpush3.xpose.msk.msra.mxu1 %vm1233_vm0, %v1205_v39 }
 0x23b   : > { %2518 = vmatprep.subr.msk.mxu1 %vm1233_vm0, %v1220_v25 }
 0x23e   : > { %2519 = vmatpush3.xpose.msk.msra.mxu1 %vm1233_vm0, %v1204_v40 }
 0x23f   : > { %2520 = vmatprep.subr.msk.mxu1 %vm1233_vm0, %v1219_v17  ;;  %v2937_v17 = vmov 1966171168  }
 0x240   : > { %v1966_v58 = vunpack.c.l.s4 %v2937_v17 }
 0x242   : > { %2521 = vmatpush3.xpose.msk.msra.mxu1 %vm1233_vm0, %v1203_v55  ;;  %v1968_v55 = vlaneseq  ;;  %v1967_v10 = vunpack.c.0.s8 %v1966_v58 }
 0x243   : > { %2522 = vmatprep.subr.msk.mxu1 %vm1233_vm0, %v1218_v50 }
 0x246   : > { %2523 = vmatpush3.xpose.msk.msra.mxu1 %vm1233_vm0, %v1202_v11  ;;  %v1969_v11 = vshrl.u32 %v1968_v55, 7 }
 0x247   : > { %2524 = vmatprep.subr.msk.mxu1 %vm1233_vm0, %v1217_v13 }
 0x24a   : > { %2525 = vmatpush3.xpose.msk.msra.mxu1 %vm1233_vm0, %v1201_v15 }
 0x24b   : > { %2526 = vmatprep.subr.msk.mxu1 %vm1233_vm0, %v1216_v2  ;;  %v1970_v2 = vsub.s32 %v1967_v10, %v1969_v11 }
 0x24e   : > { %2527 = vmatpush3.xpose.msk.msra.mxu1 %vm1233_vm0, %v1200_v26 }
 0x24f   : > { %2528 = vmatprep.subr.msk.mxu1 %vm1233_vm0, %v1215_v4 }
 0x252   : > { %2529 = vmatpush3.xpose.msk.msra.mxu1 %vm1233_vm0, %v1199_v8 }
 0x253   : > { %2530 = vmatprep.subr.msk.mxu1 %vm1233_vm0, %v1214_v12 }
 0x256   : > { %2531 = vmatpush3.xpose.msk.msra.mxu1 %vm1233_vm0, %v1198_v42 }
 0x259   : > { %2533 = vmatmul.mubr.msk.f32.vlgmr.msra.gmra.mxu1 %vm1233_vm0, %v2839_v37  ;;  %v1687_v33 = vpop.f32.mrf.mxu1 }
 0x25a   : > { %v1688_v27 = vadd.f32 %v1687_v33, %v1232_v0 }
 0x25b   : > { %v1689_v57 = vpop.f32.mrf.mxu1 }
 0x25c   : > { %v1690_v45 = vadd.f32 %v1689_v57, %v1232_v0  ;;  %v2239_v9 = vmul.f32 -1.442695, %v1688_v27 }
 0x25e   : > { %v2240_v44 = vmul.f32 -1.442695, %v1690_v45 }
 0x299   : > { %v1758_v7 = vpop.f32.mrf.mxu1 }
 0x29a   : > { %v1759_v49 = vadd.f32 %v1758_v7, %v1232_v0 }
 0x29b   : > { %v1760_v36 = vpop.f32.mrf.mxu1 }
 0x29c   : > { %v1761_v29 = vadd.f32 %v1760_v36, %v1232_v0  ;;  %v2241_v62 = vmul.f32 -1.442695, %v1759_v49 }
 0x29e   : > { %v2242_v35 = vmul.f32 -1.442695, %v1761_v29  ;;  %2807 = vpow2.f32 %v2241_v62 }
 0x2a0   : > { %2809 = vpow2.f32 %v2242_v35 }
 0x2a1   : > { %2811 = vpow2.f32 %v2239_v9 }
 0x2a2   : > { %2813 = vpow2.f32 %v2240_v44 }
 0x2ab   : > { %v2808_v28 = vpop.eup %2807 }
 0x2ac   : > { %v1931_v3 = vadd.f32 1.0, %v2808_v28 }
 0x2ad   : > { %v2810_v59 = vpop.eup %2809 }
 0x2ae   : > { %v2812_v31 = vpop.eup %2811  ;;  %v1932_v16 = vadd.f32 1.0, %v2810_v59 }
 0x2af   : > { %v2814_v63 = vpop.eup %2813  ;;  %v1929_v52 = vadd.f32 1.0, %v2812_v31 }
 0x2b0   : > { %v1930_v20 = vadd.f32 1.0, %v2814_v63 }
 0x2d9   : > { %v1829_v47 = vpop.f32.mrf.mxu1 }
 0x2da   : > { %v1830_v22 = vadd.f32 %v1829_v47, %v1232_v0 }
 0x2db   : > { %v1831_v61 = vpop.f32.mrf.mxu1 }
 0x2dc   : > { %v1832_v51 = vadd.f32 %v1831_v61, %v1232_v0  ;;  %v2243_v56 = vmul.f32 -1.442695, %v1830_v22 }
 0x2de   : > { %v2244_v18 = vmul.f32 -1.442695, %v1832_v51  ;;  %2815 = vpow2.f32 %v2243_v56 }
 0x2e0   : > { %2817 = vpow2.f32 %v2244_v18 }
 0x2eb   : > { %v2816_v1 = vpop.eup %2815 }
 0x2ec   : > { %v1933_v39 = vadd.f32 1.0, %v2816_v1 }
 0x2ed   : > { %v2818_v6 = vpop.eup %2817 }
 0x2ee   : > { %v1934_v32 = vadd.f32 1.0, %v2818_v6 }
 0x319   : > { %v1900_v46 = vpop.f32.mrf.mxu1 }
 0x31a   : > { %v1901_v14 = vadd.f32 %v1900_v46, %v1232_v0 }
 0x31b   : > { %v1902_v24 = vpop.f32.mrf.mxu1 }
 0x31c   : > { %v2245_v60 = vmul.f32 -1.442695, %v1901_v14  ;;  %v1903_v43 = vadd.f32 %v1902_v24, %v1232_v0 }
 0x31e   : > { %2819 = vpow2.f32 %v2245_v60  ;;  %v2246_v38 = vmul.f32 -1.442695, %v1903_v43 }
 0x320   : > { %2821 = vpow2.f32 %v2246_v38 }
 0x321   : > { %2823 = vrcp.f32 %v1931_v3 }
 0x322   : > { %2825 = vrcp.f32 %v1932_v16 }
 0x323   : > { %2827 = vrcp.f32 %v1929_v52 }
 0x324   : > { %2829 = vrcp.f32 %v1930_v20 }
 0x325   : > { %2831 = vrcp.f32 %v1933_v39 }
 0x326   : > { %2833 = vrcp.f32 %v1934_v32 }
 0x32b   : > { %v2820_v54 = vpop.eup %2819 }
 0x32c   : > { %v1935_v25 = vadd.f32 1.0, %v2820_v54 }
 0x32d   : > { %v2822_v48 = vpop.eup %2821 }
 0x32e   : > { %v1936_v40 = vadd.f32 1.0, %v2822_v48  ;;  %2835 = vrcp.f32 %v1935_v25  ;;  %v2824_v23 = vpop.eup %2823 }
 0x32f   : > { %v2826_v41 = vpop.eup %2825 }
 0x330   : > { %2837 = vrcp.f32 %v1936_v40  ;;  %v2828_v50 = vpop.eup %2827  ;;  %v1962_v15 = vcombine.low %v2824_v23, %v2826_v41 }
 0x331   : > { %v2830_v13 = vpop.eup %2829 }
 0x332   : > { %v2832_v34 = vpop.eup %2831  ;;  %v1961_v5 = vcombine.low %v2828_v50, %v2830_v13  ;;  %v1978_v4 = vrot.slane %v1962_v15, %v1970_v2 }
 0x333   : > { %v2834_v19 = vpop.eup %2833 }
 0x334   : > { %v1963_v26 = vcombine.low %v2832_v34, %v2834_v19  ;;  %v1971_v30 = vrot.slane %v1961_v5, %v1970_v2 }
 0x336   : > { %v1985_v12 = vrot.slane %v1963_v26, %v1970_v2  ;;  %v1993_v37 = vcombine.low %v1971_v30, %v1978_v4 }
 0x338   : > { %v2001_v57 = vrot.slane %v1993_v37, %v1970_v2 }
 0x33b   : > { %v2836_v21 = vpop.eup %2835 }
 0x33d   : > { %v2838_v53 = vpop.eup %2837 }
 0x33e   : > { %v1964_v8 = vcombine.low %v2836_v21, %v2838_v53 }
 0x340   : > { %v1992_v42 = vrot.slane %v1964_v8, %v1970_v2 }
 0x342   : > { %v1994_v33 = vcombine.low %v1985_v12, %v1992_v42 }
 0x344   : > { %v2008_v7 = vrot.slane %v1994_v33, %v1970_v2 }
 0x346   : > { %v2009_v36 = vcombine.low %v2001_v57, %v2008_v7 }
 0x348   : > { %2011 = vst [vmem:[%s243_s11] sm:$0xff] %v2009_v36 }
 0x349   : > { %2881 = shalt.err (!%p2878_p10)
}
 0x34a   : > { %s2882_s27 = scalar_lea.hbm %s2025_s24, 128  ;;  %s2886_s26 = scalar_lea.hbm %s3868_s5, 256 }
 0x34b   : > { %p2883_p0 = scmp.ne.s32.totalorder %s2025_s24, %s2882_s27  ;;  %p2887_p1 = scmp.lt.s32.totalorder %s2025_s24, %s3868_s5 }
 0x34c   : > { %p2888_p3 = scmp.lt.s32.totalorder %s2886_s26, %s2882_s27 }
 0x34d   : > { %p2884_p2 = pnand %p2883_p0, %p3877_p12 }
 0x34e   : > { %p2889_p6 = por %p2888_p3, %p2887_p1 }
 0x34f   : > { %p2885_p9 = pneg %p2884_p2 }
 0x351   : > { %p2890_p11 = pnand %p2889_p6, %p2885_p9 }
 0x353   : > { %2893 = shalt.err (!%p2890_p11)
}
 0x354   : > { %2760 = dma.vmem_to_hbm [thread:$0]  (%p3877_p12), %s2028_s12, 128, %s2025_s24, %s2013_s13  }
 0x355 PF: > { %s2039_s9 = sand.u32 1, %s2920_s20   ;;  %p3878_p13 = scmp.ne.s32.totalorder %s3874_s7, 0 }
 0x356   : > { %p3879_p4 = scmp.ge.s32.totalorder %s2932_s23, 2  ;;  %s2040_s10 = scalar_lea.sflag [#allocation5], %s2039_s9 }
 0x358   : > { %p2767_p5 = pnand %p3879_p4, %p3878_p13 }
 0x35a   : > { %p2768_p7 = pneg %p2767_p5 }
 0x35c   : > { %2915 = dma.done.wait (%p2768_p7), %s2040_s10, 128  }
 0x35d   : > { %2917 = vsyncadd (%p2768_p7), %s2040_s10, 4294967168  ;;  %p19_p8 = scmp.ge.s32.totalorder %s2997_s25, 4   ;;  %s3880_s20 = smov %s2924_s21 }
 0x35e   : > { %s3881_s21 = smov %s2928_s22  ;;  %s3882_s22 = smov %s3009_s28 }
 0x35f   : > { %s3883_s23 = smov %s2997_s25  ;;  %21 = sbr.rel (!%p19_p8) target bundleno = 7 (0x7), region = 85 }
 0x364   :  { %2045 = vsyncpa [#allocation4], 1 }
 0x365   :  { %2047 = vsyncpa [#allocation4 + $0x1], 1 }
 0x366   :  { %2048 = vsyncpa [#allocation5], 1 }
 0x367   :  { %2050 = vsyncpa [#allocation5 + $0x1], 1 }

</bundles_post_ra>
